<compile_context>
chip_gen: v7x
topology: tpu7x:2x2x1
jax: 0.10.0
libtpu: 0.0.40
codegen_flags: <defaults>
</compile_context>

<pallas_src>
import functools

import jax
import jax.numpy as jnp
from jax import lax
from jax.experimental import pallas as pl
from jax.experimental.pallas import tpu as pltpu


# -----------------------------------------------------------------------------
# In-kernel helpers
# -----------------------------------------------------------------------------
def _pool_rows(y):
    """2x2 max-pool along the row (H) axis: max of adjacent row pairs."""
    r = y.shape[0]
    return jnp.concatenate(
        [jnp.maximum(y[2 * k:2 * k + 1, :], y[2 * k + 1:2 * k + 2, :])
         for k in range(r // 2)],
        axis=0,
    )


def _fused_kernel(x_ref, w1_ref, b1_ref, w2_ref, b2_ref, wfc_ref, bfc_ref,
                  o_ref, *, N, C0, C1, C2, H1, W1, CLS):
    """Fully fused FlowerNN forward for one grid step (whole batch).

    x_ref  : (N, H1+2, (W1+2)*C0)  zero-padded NHWC input, rows=(h), cols=(w,c)
    w1_ref : (9, W1*C0, W1*C1)     block-diag conv1 tap weights (pool-permuted cols)
    b1_ref : (1, W1*C1)            conv1 bias tiled over w
    w2_ref : (9, W2*C1, W2*C2)     block-diag conv2 tap weights
    b2_ref : (1, W2*C2)            conv2 bias tiled over w
    wfc_ref: (H3, W3*C2, CLS)      FC weight, permuted to the in-kernel layout
    bfc_ref: (1, CLS)
    o_ref  : (N, CLS)              logits
    """
    H2, W2 = H1 // 2, W1 // 2
    H3 = H2 // 2

    feats = []
    for n in range(N):  # N is tiny; unrolled — still a single kernel launch
        xp = x_ref[n]                                   # (H1+2, (W1+2)*C0)

        # ---- conv1 (3x3, pad 1) as 9 shifted tap GEMMs, f32 accumulation ----
        acc = jnp.zeros((H1, W1 * C1), jnp.float32)     # 128 lanes, lane-dense
        for kh in range(3):
            for kw in range(3):
                lhs = xp[kh:kh + H1, kw * C0:(kw + W1) * C0]        # (H1, W1*C0)
                acc = acc + jnp.dot(lhs, w1_ref[kh * 3 + kw],
                                    preferred_element_type=jnp.float32)
        y = jnp.maximum(acc + b1_ref[...], 0.0)          # bias + ReLU
        half = (W1 // 2) * C1
        yw = jnp.maximum(y[:, :half], y[:, half:])       # W-pool (even|odd halves)
        p1 = _pool_rows(yw)                              # H-pool -> (H2, W2*C1)

        # ---- conv2 on zero-padded pooled activation ----
        zc = jnp.zeros((H2, C1), jnp.float32)
        zr = jnp.zeros((1, (W2 + 2) * C1), jnp.float32)
        p1p = jnp.concatenate(
            [zr, jnp.concatenate([zc, p1, zc], axis=1), zr], axis=0)  # (H2+2, (W2+2)*C1)
        acc2 = jnp.zeros((H2, W2 * C2), jnp.float32)     # 128 lanes, lane-dense
        for kh in range(3):
            for kw in range(3):
                lhs = p1p[kh:kh + H2, kw * C1:(kw + W2) * C1]       # (H2, W2*C1)
                acc2 = acc2 + jnp.dot(lhs, w2_ref[kh * 3 + kw],
                                      preferred_element_type=jnp.float32)
        y2 = jnp.maximum(acc2 + b2_ref[...], 0.0)
        half2 = (W2 // 2) * C2
        y2w = jnp.maximum(y2[:, :half2], y2[:, half2:])  # W-pool
        feats.append(_pool_rows(y2w))                    # (H3, W3*C2)

    # ---- FC (dropout is identity in eval; the extra F.relu is a no-op on
    #          max-pooled ReLU outputs, so it is omitted) ----
    acc_fc = jnp.zeros((N, CLS), jnp.float32)
    for h in range(H3):
        lhs = jnp.concatenate([f[h:h + 1, :] for f in feats], axis=0)  # (N, W3*C2)
        acc_fc = acc_fc + jnp.dot(lhs, wfc_ref[h],
                                  preferred_element_type=jnp.float32)
    o_ref[...] = acc_fc + bfc_ref[...]


# -----------------------------------------------------------------------------
# Wrapper: weight/input layout prep (plain JAX, folded into XLA input prep)
# -----------------------------------------------------------------------------
def _conv_taps_blockdiag(w_conv, w_spatial):
    """(Cout, Cin, 3, 3) -> (9, W*Cin, W*Cout) block-diagonal tap weights.

    Output-w columns are permuted to [even w | odd w] so the 2x2 W-pool in the
    kernel is max(first half, second half) of contiguous lanes.
    """
    cout, cin, kh, kw = w_conv.shape
    wt = jnp.transpose(w_conv, (2, 3, 1, 0)).reshape(kh * kw, cin, cout)  # (t,ci,co)
    eye = jnp.eye(w_spatial, dtype=w_conv.dtype)
    blk = jnp.einsum('wv,tio->twivo', eye, wt)            # (t, w, ci, v, co)
    blk = blk.reshape(kh * kw, w_spatial * cin, w_spatial, cout)
    perm = jnp.concatenate([jnp.arange(0, w_spatial, 2),
                            jnp.arange(1, w_spatial, 2)])
    blk = blk[:, :, perm, :]
    return blk.reshape(kh * kw, w_spatial * cin, w_spatial * cout)


def flower_nn_forward(x_nchw, params):
    """Forward pass matching FlowerNN.forward (eval mode), layer_count=2."""
    (w1, b1), (w2, b2) = params["convs"]
    w_fc, b_fc = params["fc"]

    N, C0, H1, W1 = x_nchw.shape
    C1, C2 = w1.shape[0], w2.shape[0]
    H2, W2 = H1 // 2, W1 // 2
    H3, W3 = H2 // 2, W2 // 2
    CLS = w_fc.shape[0]

    # Zero-padded NHWC input; per-batch 2D layout: rows=(h_pad), cols=(w_pad, c)
    x_nhwc = jnp.transpose(x_nchw, (0, 2, 3, 1))
    xpad = jnp.pad(x_nhwc, ((0, 0), (1, 1), (1, 1), (0, 0)))
    xpad = xpad.reshape(N, H1 + 2, (W1 + 2) * C0)

    w1_blk = _conv_taps_blockdiag(w1, W1)                 # (9, W1*C0, W1*C1)
    b1_t = jnp.tile(b1, W1).reshape(1, W1 * C1)
    w2_blk = _conv_taps_blockdiag(w2, W2)                 # (9, W2*C1, W2*C2)
    b2_t = jnp.tile(b2, W2).reshape(1, W2 * C2)

    # FC weight permuted so that the in-kernel (h3, w3*C2+c2) feature layout
    # matches torch's NCHW flatten (f = c2*H3*W3 + h3*W3 + w3).
    wfc_r = jnp.transpose(w_fc.reshape(CLS, C2, H3, W3), (2, 3, 1, 0))
    wfc_r = wfc_r.reshape(H3, W3 * C2, CLS)
    bfc_r = b_fc.reshape(1, CLS)

    kernel = functools.partial(
        _fused_kernel, N=N, C0=C0, C1=C1, C2=C2, H1=H1, W1=W1, CLS=CLS)

    # TODO(synk): nn.Dropout(p=0.5) in training mode (stochastic) not implemented;
    #             eval-mode dropout is the identity.
    # Note: a batch-parallel grid axis would only help on v7x (2 TCs); at this
    # size a single grid step avoids per-step overhead on v5e/v6e.
    return pl.pallas_call(
        kernel,
        out_shape=jax.ShapeDtypeStruct((N, CLS), jnp.float32),
        grid=(1,),
        in_specs=[
            pl.BlockSpec((N, H1 + 2, (W1 + 2) * C0), lambda i: (0, 0, 0)),
            pl.BlockSpec((9, W1 * C0, W1 * C1), lambda i: (0, 0, 0)),
            pl.BlockSpec((1, W1 * C1), lambda i: (0, 0)),
            pl.BlockSpec((9, W2 * C1, W2 * C2), lambda i: (0, 0, 0)),
            pl.BlockSpec((1, W2 * C2), lambda i: (0, 0)),
            pl.BlockSpec((H3, W3 * C2, CLS), lambda i: (0, 0, 0)),
            pl.BlockSpec((1, CLS), lambda i: (0, 0)),
        ],
        out_specs=pl.BlockSpec((N, CLS), lambda i: (0, 0)),
        compiler_params=pltpu.CompilerParams(dimension_semantics=("arbitrary",)),
    )(xpad, w1_blk, b1_t, w2_blk, b2_t, wfc_r, bfc_r)


# -----------------------------------------------------------------------------
# Pure-JAX reference (for correctness check)
# -----------------------------------------------------------------------------
def reference_forward(x_nchw, params):
    x = jnp.transpose(x_nchw, (0, 2, 3, 1))
    for w, b in params["convs"]:
        y = lax.conv_general_dilated(
            x,
            jnp.transpose(w, (2, 3, 1, 0)),  # (Cout,Cin,KH,KW) -> HWIO
            window_strides=(1, 1),
            padding=((1, 1), (1, 1)),
            dimension_numbers=("NHWC", "HWIO", "NHWC"),
        )
        y = jax.nn.relu(y + b)
        N, H, W, C = y.shape
        x = y.reshape(N, H // 2, 2, W // 2, 2, C).max(axis=(2, 4))
    N, Hf, Wf, Cf = x.shape
    feat = jnp.transpose(x, (0, 3, 1, 2)).reshape(N, -1)
    feat = jax.nn.relu(feat)
    w_fc, b_fc = params["fc"]
    return feat @ w_fc.T + b_fc


# -----------------------------------------------------------------------------
# Deterministic parameter init + run
# -----------------------------------------------------------------------------
def init_params(key):
    in_channels = 3
    out_channels = [8, 16]
    classes = 10
    fc_in = 4 * 4 * out_channels[-1]  # (16/divisor)^2 * out_channels[layers-1]

    keys = jax.random.split(key, 6)
    convs = []
    cin = in_channels
    for i, cout in enumerate(out_channels):
        fan_in = cin * 9
        w = jax.random.normal(keys[2 * i], (cout, cin, 3, 3), jnp.float32) / jnp.sqrt(
            float(fan_in))
        b = 0.01 * jax.random.normal(keys[2 * i + 1], (cout,), jnp.float32)
        convs.append((w, b))
        cin = cout
    w_fc = jax.random.normal(keys[4], (classes, fc_in), jnp.float32) / jnp.sqrt(
        float(fc_in))
    b_fc = 0.01 * jax.random.normal(keys[5], (classes,), jnp.float32)
    return {"convs": convs, "fc": (w_fc, b_fc)}


if __name__ == "__main__":
    key = jax.random.PRNGKey(0)
    k_params, k_x = jax.random.split(key)
    params = init_params(k_params)

    # batch=2, channels=3 (RGB), spatial 16x16 — consistent with the module.
    x = jax.random.normal(k_x, (2, 3, 16, 16), jnp.float32)

    out = jax.block_until_ready(flower_nn_forward(x, params))
    ref = jax.block_until_ready(reference_forward(x, params))

    assert out.shape == (2, 10), out.shape
    max_err = float(jnp.max(jnp.abs(out - ref)))
    assert max_err < 2e-4, f"mismatch vs reference: {max_err}"

    print("KERNEL_OK")
</pallas_src>

<mosaic_0001>
module attributes {stable_mosaic.version = 11 : i64} {
  func.func @_fused_kernel(%arg0: i32, %arg1: memref<2x18x54xf32, #tpu.memory_space<vmem>>, %arg2: memref<9x48x128xf32, #tpu.memory_space<vmem>>, %arg3: memref<1x128xf32, #tpu.memory_space<vmem>>, %arg4: memref<9x64x128xf32, #tpu.memory_space<vmem>>, %arg5: memref<1x128xf32, #tpu.memory_space<vmem>>, %arg6: memref<4x64x10xf32, #tpu.memory_space<vmem>>, %arg7: memref<1x10xf32, #tpu.memory_space<vmem>>, %arg8: memref<2x10xf32, #tpu.memory_space<vmem>>) attributes {dimension_semantics = [#tpu.dimension_semantics<arbitrary>], iteration_bounds = array<i64: 1>, scalar_prefetch = 0 : i64, scratch_operands = 0 : i64, tpu.core_type = #tpu.core_type<tc>, window_params = [{pipeline_mode = #tpu.pipeline_mode<synchronous>, transform_indices = @transform_0, window_bounds = array<i64: 2, 18, 54>}, {pipeline_mode = #tpu.pipeline_mode<synchronous>, transform_indices = @transform_1, window_bounds = array<i64: 9, 48, 128>}, {pipeline_mode = #tpu.pipeline_mode<synchronous>, transform_indices = @transform_2, window_bounds = array<i64: 1, 128>}, {pipeline_mode = #tpu.pipeline_mode<synchronous>, transform_indices = @transform_3, window_bounds = array<i64: 9, 64, 128>}, {pipeline_mode = #tpu.pipeline_mode<synchronous>, transform_indices = @transform_4, window_bounds = array<i64: 1, 128>}, {pipeline_mode = #tpu.pipeline_mode<synchronous>, transform_indices = @transform_5, window_bounds = array<i64: 4, 64, 10>}, {pipeline_mode = #tpu.pipeline_mode<synchronous>, transform_indices = @transform_6, window_bounds = array<i64: 1, 10>}, {pipeline_mode = #tpu.pipeline_mode<synchronous>, transform_indices = @transform_7, window_bounds = array<i64: 2, 10>}]} {
    %c0 = arith.constant 0 : index
    %c0_0 = arith.constant 0 : index
    %c0_1 = arith.constant 0 : index
    %0 = vector.load %arg1[%c0, %c0_0, %c0_1] : memref<2x18x54xf32, #tpu.memory_space<vmem>>, vector<1x18x54xf32>
    %1 = vector.shape_cast %0 : vector<1x18x54xf32> to vector<18x54xf32>
    %cst = arith.constant 0.000000e+00 : f32
    %2 = vector.broadcast %cst : f32 to vector<16x128xf32>
    %3 = vector.extract_strided_slice %1 {offsets = [0, 0], sizes = [16, 48], strides = [1, 1]} : vector<18x54xf32> to vector<16x48xf32>
    %c0_2 = arith.constant 0 : index
    %c0_3 = arith.constant 0 : index
    %c0_4 = arith.constant 0 : index
    %4 = vector.load %arg2[%c0_2, %c0_3, %c0_4] : memref<9x48x128xf32, #tpu.memory_space<vmem>>, vector<1x48x128xf32>
    %5 = vector.shape_cast %4 : vector<1x48x128xf32> to vector<48x128xf32>
    %cst_5 = arith.constant dense<0.000000e+00> : vector<16x128xf32>
    %6 = tpu.matmul %3, %5, %cst_5 {dimension_numbers = #tpu.dot_dimension_numbers<[1], [0], [0], [1], [0, 0, 1, 1], [], []>} : vector<16x48xf32>, vector<48x128xf32>, vector<16x128xf32> -> vector<16x128xf32>
    %7 = arith.addf %2, %6 : vector<16x128xf32>
    %8 = vector.extract_strided_slice %1 {offsets = [0, 3], sizes = [16, 48], strides = [1, 1]} : vector<18x54xf32> to vector<16x48xf32>
    %c1 = arith.constant 1 : index
    %c0_6 = arith.constant 0 : index
    %c0_7 = arith.constant 0 : index
    %9 = vector.load %arg2[%c1, %c0_6, %c0_7] : memref<9x48x128xf32, #tpu.memory_space<vmem>>, vector<1x48x128xf32>
    %10 = vector.shape_cast %9 : vector<1x48x128xf32> to vector<48x128xf32>
    %cst_8 = arith.constant dense<0.000000e+00> : vector<16x128xf32>
    %11 = tpu.matmul %8, %10, %cst_8 {dimension_numbers = #tpu.dot_dimension_numbers<[1], [0], [0], [1], [0, 0, 1, 1], [], []>} : vector<16x48xf32>, vector<48x128xf32>, vector<16x128xf32> -> vector<16x128xf32>
    %12 = arith.addf %7, %11 : vector<16x128xf32>
    %13 = vector.extract_strided_slice %1 {offsets = [0, 6], sizes = [16, 48], strides = [1, 1]} : vector<18x54xf32> to vector<16x48xf32>
    %c2 = arith.constant 2 : index
    %c0_9 = arith.constant 0 : index
    %c0_10 = arith.constant 0 : index
    %14 = vector.load %arg2[%c2, %c0_9, %c0_10] : memref<9x48x128xf32, #tpu.memory_space<vmem>>, vector<1x48x128xf32>
    %15 = vector.shape_cast %14 : vector<1x48x128xf32> to vector<48x128xf32>
    %cst_11 = arith.constant dense<0.000000e+00> : vector<16x128xf32>
    %16 = tpu.matmul %13, %15, %cst_11 {dimension_numbers = #tpu.dot_dimension_numbers<[1], [0], [0], [1], [0, 0, 1, 1], [], []>} : vector<16x48xf32>, vector<48x128xf32>, vector<16x128xf32> -> vector<16x128xf32>
    %17 = arith.addf %12, %16 : vector<16x128xf32>
    %18 = vector.extract_strided_slice %1 {offsets = [1, 0], sizes = [16, 48], strides = [1, 1]} : vector<18x54xf32> to vector<16x48xf32>
    %c3 = arith.constant 3 : index
    %c0_12 = arith.constant 0 : index
    %c0_13 = arith.constant 0 : index
    %19 = vector.load %arg2[%c3, %c0_12, %c0_13] : memref<9x48x128xf32, #tpu.memory_space<vmem>>, vector<1x48x128xf32>
    %20 = vector.shape_cast %19 : vector<1x48x128xf32> to vector<48x128xf32>
    %cst_14 = arith.constant dense<0.000000e+00> : vector<16x128xf32>
    %21 = tpu.matmul %18, %20, %cst_14 {dimension_numbers = #tpu.dot_dimension_numbers<[1], [0], [0], [1], [0, 0, 1, 1], [], []>} : vector<16x48xf32>, vector<48x128xf32>, vector<16x128xf32> -> vector<16x128xf32>
    %22 = arith.addf %17, %21 : vector<16x128xf32>
    %23 = vector.extract_strided_slice %1 {offsets = [1, 3], sizes = [16, 48], strides = [1, 1]} : vector<18x54xf32> to vector<16x48xf32>
    %c4 = arith.constant 4 : index
    %c0_15 = arith.constant 0 : index
    %c0_16 = arith.constant 0 : index
    %24 = vector.load %arg2[%c4, %c0_15, %c0_16] : memref<9x48x128xf32, #tpu.memory_space<vmem>>, vector<1x48x128xf32>
    %25 = vector.shape_cast %24 : vector<1x48x128xf32> to vector<48x128xf32>
    %cst_17 = arith.constant dense<0.000000e+00> : vector<16x128xf32>
    %26 = tpu.matmul %23, %25, %cst_17 {dimension_numbers = #tpu.dot_dimension_numbers<[1], [0], [0], [1], [0, 0, 1, 1], [], []>} : vector<16x48xf32>, vector<48x128xf32>, vector<16x128xf32> -> vector<16x128xf32>
    %27 = arith.addf %22, %26 : vector<16x128xf32>
    %28 = vector.extract_strided_slice %1 {offsets = [1, 6], sizes = [16, 48], strides = [1, 1]} : vector<18x54xf32> to vector<16x48xf32>
    %c5 = arith.constant 5 : index
    %c0_18 = arith.constant 0 : index
    %c0_19 = arith.constant 0 : index
    %29 = vector.load %arg2[%c5, %c0_18, %c0_19] : memref<9x48x128xf32, #tpu.memory_space<vmem>>, vector<1x48x128xf32>
    %30 = vector.shape_cast %29 : vector<1x48x128xf32> to vector<48x128xf32>
    %cst_20 = arith.constant dense<0.000000e+00> : vector<16x128xf32>
    %31 = tpu.matmul %28, %30, %cst_20 {dimension_numbers = #tpu.dot_dimension_numbers<[1], [0], [0], [1], [0, 0, 1, 1], [], []>} : vector<16x48xf32>, vector<48x128xf32>, vector<16x128xf32> -> vector<16x128xf32>
    %32 = arith.addf %27, %31 : vector<16x128xf32>
    %33 = vector.extract_strided_slice %1 {offsets = [2, 0], sizes = [16, 48], strides = [1, 1]} : vector<18x54xf32> to vector<16x48xf32>
    %c6 = arith.constant 6 : index
    %c0_21 = arith.constant 0 : index
    %c0_22 = arith.constant 0 : index
    %34 = vector.load %arg2[%c6, %c0_21, %c0_22] : memref<9x48x128xf32, #tpu.memory_space<vmem>>, vector<1x48x128xf32>
    %35 = vector.shape_cast %34 : vector<1x48x128xf32> to vector<48x128xf32>
    %cst_23 = arith.constant dense<0.000000e+00> : vector<16x128xf32>
    %36 = tpu.matmul %33, %35, %cst_23 {dimension_numbers = #tpu.dot_dimension_numbers<[1], [0], [0], [1], [0, 0, 1, 1], [], []>} : vector<16x48xf32>, vector<48x128xf32>, vector<16x128xf32> -> vector<16x128xf32>
    %37 = arith.addf %32, %36 : vector<16x128xf32>
    %38 = vector.extract_strided_slice %1 {offsets = [2, 3], sizes = [16, 48], strides = [1, 1]} : vector<18x54xf32> to vector<16x48xf32>
    %c7 = arith.constant 7 : index
    %c0_24 = arith.constant 0 : index
    %c0_25 = arith.constant 0 : index
    %39 = vector.load %arg2[%c7, %c0_24, %c0_25] : memref<9x48x128xf32, #tpu.memory_space<vmem>>, vector<1x48x128xf32>
    %40 = vector.shape_cast %39 : vector<1x48x128xf32> to vector<48x128xf32>
    %cst_26 = arith.constant dense<0.000000e+00> : vector<16x128xf32>
    %41 = tpu.matmul %38, %40, %cst_26 {dimension_numbers = #tpu.dot_dimension_numbers<[1], [0], [0], [1], [0, 0, 1, 1], [], []>} : vector<16x48xf32>, vector<48x128xf32>, vector<16x128xf32> -> vector<16x128xf32>
    %42 = arith.addf %37, %41 : vector<16x128xf32>
    %43 = vector.extract_strided_slice %1 {offsets = [2, 6], sizes = [16, 48], strides = [1, 1]} : vector<18x54xf32> to vector<16x48xf32>
    %c8 = arith.constant 8 : index
    %c0_27 = arith.constant 0 : index
    %c0_28 = arith.constant 0 : index
    %44 = vector.load %arg2[%c8, %c0_27, %c0_28] : memref<9x48x128xf32, #tpu.memory_space<vmem>>, vector<1x48x128xf32>
    %45 = vector.shape_cast %44 : vector<1x48x128xf32> to vector<48x128xf32>
    %cst_29 = arith.constant dense<0.000000e+00> : vector<16x128xf32>
    %46 = tpu.matmul %43, %45, %cst_29 {dimension_numbers = #tpu.dot_dimension_numbers<[1], [0], [0], [1], [0, 0, 1, 1], [], []>} : vector<16x48xf32>, vector<48x128xf32>, vector<16x128xf32> -> vector<16x128xf32>
    %47 = arith.addf %42, %46 : vector<16x128xf32>
    %c0_30 = arith.constant 0 : index
    %c0_31 = arith.constant 0 : index
    %48 = vector.load %arg3[%c0_30, %c0_31] : memref<1x128xf32, #tpu.memory_space<vmem>>, vector<1x128xf32>
    %49 = vector.broadcast %48 : vector<1x128xf32> to vector<16x128xf32>
    %50 = arith.addf %47, %49 : vector<16x128xf32>
    %cst_32 = arith.constant 0.000000e+00 : f32
    %51 = vector.broadcast %cst_32 : f32 to vector<16x128xf32>
    %52 = arith.maximumf %50, %51 : vector<16x128xf32>
    %53 = vector.extract_strided_slice %52 {offsets = [0, 0], sizes = [16, 64], strides = [1, 1]} : vector<16x128xf32> to vector<16x64xf32>
    %54 = vector.extract_strided_slice %52 {offsets = [0, 64], sizes = [16, 64], strides = [1, 1]} : vector<16x128xf32> to vector<16x64xf32>
    %55 = arith.maximumf %53, %54 : vector<16x64xf32>
    %56 = vector.extract_strided_slice %55 {offsets = [0, 0], sizes = [1, 64], strides = [1, 1]} : vector<16x64xf32> to vector<1x64xf32>
    %57 = vector.extract_strided_slice %55 {offsets = [1, 0], sizes = [1, 64], strides = [1, 1]} : vector<16x64xf32> to vector<1x64xf32>
    %58 = arith.maximumf %56, %57 : vector<1x64xf32>
    %59 = vector.extract_strided_slice %55 {offsets = [2, 0], sizes = [1, 64], strides = [1, 1]} : vector<16x64xf32> to vector<1x64xf32>
    %60 = vector.extract_strided_slice %55 {offsets = [3, 0], sizes = [1, 64], strides = [1, 1]} : vector<16x64xf32> to vector<1x64xf32>
    %61 = arith.maximumf %59, %60 : vector<1x64xf32>
    %62 = vector.extract_strided_slice %55 {offsets = [4, 0], sizes = [1, 64], strides = [1, 1]} : vector<16x64xf32> to vector<1x64xf32>
    %63 = vector.extract_strided_slice %55 {offsets = [5, 0], sizes = [1, 64], strides = [1, 1]} : vector<16x64xf32> to vector<1x64xf32>
    %64 = arith.maximumf %62, %63 : vector<1x64xf32>
    %65 = vector.extract_strided_slice %55 {offsets = [6, 0], sizes = [1, 64], strides = [1, 1]} : vector<16x64xf32> to vector<1x64xf32>
    %66 = vector.extract_strided_slice %55 {offsets = [7, 0], sizes = [1, 64], strides = [1, 1]} : vector<16x64xf32> to vector<1x64xf32>
    %67 = arith.maximumf %65, %66 : vector<1x64xf32>
    %68 = vector.extract_strided_slice %55 {offsets = [8, 0], sizes = [1, 64], strides = [1, 1]} : vector<16x64xf32> to vector<1x64xf32>
    %69 = vector.extract_strided_slice %55 {offsets = [9, 0], sizes = [1, 64], strides = [1, 1]} : vector<16x64xf32> to vector<1x64xf32>
    %70 = arith.maximumf %68, %69 : vector<1x64xf32>
    %71 = vector.extract_strided_slice %55 {offsets = [10, 0], sizes = [1, 64], strides = [1, 1]} : vector<16x64xf32> to vector<1x64xf32>
    %72 = vector.extract_strided_slice %55 {offsets = [11, 0], sizes = [1, 64], strides = [1, 1]} : vector<16x64xf32> to vector<1x64xf32>
    %73 = arith.maximumf %71, %72 : vector<1x64xf32>
    %74 = vector.extract_strided_slice %55 {offsets = [12, 0], sizes = [1, 64], strides = [1, 1]} : vector<16x64xf32> to vector<1x64xf32>
    %75 = vector.extract_strided_slice %55 {offsets = [13, 0], sizes = [1, 64], strides = [1, 1]} : vector<16x64xf32> to vector<1x64xf32>
    %76 = arith.maximumf %74, %75 : vector<1x64xf32>
    %77 = vector.extract_strided_slice %55 {offsets = [14, 0], sizes = [1, 64], strides = [1, 1]} : vector<16x64xf32> to vector<1x64xf32>
    %78 = vector.extract_strided_slice %55 {offsets = [15, 0], sizes = [1, 64], strides = [1, 1]} : vector<16x64xf32> to vector<1x64xf32>
    %79 = arith.maximumf %77, %78 : vector<1x64xf32>
    %80 = tpu.concatenate %58, %61, %64, %67, %70, %73, %76, %79 in 0 : vector<1x64xf32>, vector<1x64xf32>, vector<1x64xf32>, vector<1x64xf32>, vector<1x64xf32>, vector<1x64xf32>, vector<1x64xf32>, vector<1x64xf32> -> vector<8x64xf32>
    %cst_33 = arith.constant 0.000000e+00 : f32
    %81 = vector.broadcast %cst_33 : f32 to vector<8x8xf32>
    %cst_34 = arith.constant 0.000000e+00 : f32
    %82 = vector.broadcast %cst_34 : f32 to vector<1x80xf32>
    %83 = tpu.concatenate %81, %80, %81 in 1 : vector<8x8xf32>, vector<8x64xf32>, vector<8x8xf32> -> vector<8x80xf32>
    %84 = tpu.concatenate %82, %83, %82 in 0 : vector<1x80xf32>, vector<8x80xf32>, vector<1x80xf32> -> vector<10x80xf32>
    %cst_35 = arith.constant 0.000000e+00 : f32
    %85 = vector.broadcast %cst_35 : f32 to vector<8x128xf32>
    %86 = vector.extract_strided_slice %84 {offsets = [0, 0], sizes = [8, 64], strides = [1, 1]} : vector<10x80xf32> to vector<8x64xf32>
    %c0_36 = arith.constant 0 : index
    %c0_37 = arith.constant 0 : index
    %c0_38 = arith.constant 0 : index
    %87 = vector.load %arg4[%c0_36, %c0_37, %c0_38] : memref<9x64x128xf32, #tpu.memory_space<vmem>>, vector<1x64x128xf32>
    %88 = vector.shape_cast %87 : vector<1x64x128xf32> to vector<64x128xf32>
    %cst_39 = arith.constant dense<0.000000e+00> : vector<8x128xf32>
    %89 = tpu.matmul %86, %88, %cst_39 {dimension_numbers = #tpu.dot_dimension_numbers<[1], [0], [0], [1], [0, 0, 1, 1], [], []>} : vector<8x64xf32>, vector<64x128xf32>, vector<8x128xf32> -> vector<8x128xf32>
    %90 = arith.addf %85, %89 : vector<8x128xf32>
    %91 = vector.extract_strided_slice %84 {offsets = [0, 8], sizes = [8, 64], strides = [1, 1]} : vector<10x80xf32> to vector<8x64xf32>
    %c1_40 = arith.constant 1 : index
    %c0_41 = arith.constant 0 : index
    %c0_42 = arith.constant 0 : index
    %92 = vector.load %arg4[%c1_40, %c0_41, %c0_42] : memref<9x64x128xf32, #tpu.memory_space<vmem>>, vector<1x64x128xf32>
    %93 = vector.shape_cast %92 : vector<1x64x128xf32> to vector<64x128xf32>
    %cst_43 = arith.constant dense<0.000000e+00> : vector<8x128xf32>
    %94 = tpu.matmul %91, %93, %cst_43 {dimension_numbers = #tpu.dot_dimension_numbers<[1], [0], [0], [1], [0, 0, 1, 1], [], []>} : vector<8x64xf32>, vector<64x128xf32>, vector<8x128xf32> -> vector<8x128xf32>
    %95 = arith.addf %90, %94 : vector<8x128xf32>
    %96 = vector.extract_strided_slice %84 {offsets = [0, 16], sizes = [8, 64], strides = [1, 1]} : vector<10x80xf32> to vector<8x64xf32>
    %c2_44 = arith.constant 2 : index
    %c0_45 = arith.constant 0 : index
    %c0_46 = arith.constant 0 : index
    %97 = vector.load %arg4[%c2_44, %c0_45, %c0_46] : memref<9x64x128xf32, #tpu.memory_space<vmem>>, vector<1x64x128xf32>
    %98 = vector.shape_cast %97 : vector<1x64x128xf32> to vector<64x128xf32>
    %cst_47 = arith.constant dense<0.000000e+00> : vector<8x128xf32>
    %99 = tpu.matmul %96, %98, %cst_47 {dimension_numbers = #tpu.dot_dimension_numbers<[1], [0], [0], [1], [0, 0, 1, 1], [], []>} : vector<8x64xf32>, vector<64x128xf32>, vector<8x128xf32> -> vector<8x128xf32>
    %100 = arith.addf %95, %99 : vector<8x128xf32>
    %101 = vector.extract_strided_slice %84 {offsets = [1, 0], sizes = [8, 64], strides = [1, 1]} : vector<10x80xf32> to vector<8x64xf32>
    %c3_48 = arith.constant 3 : index
    %c0_49 = arith.constant 0 : index
    %c0_50 = arith.constant 0 : index
    %102 = vector.load %arg4[%c3_48, %c0_49, %c0_50] : memref<9x64x128xf32, #tpu.memory_space<vmem>>, vector<1x64x128xf32>
    %103 = vector.shape_cast %102 : vector<1x64x128xf32> to vector<64x128xf32>
    %cst_51 = arith.constant dense<0.000000e+00> : vector<8x128xf32>
    %104 = tpu.matmul %101, %103, %cst_51 {dimension_numbers = #tpu.dot_dimension_numbers<[1], [0], [0], [1], [0, 0, 1, 1], [], []>} : vector<8x64xf32>, vector<64x128xf32>, vector<8x128xf32> -> vector<8x128xf32>
    %105 = arith.addf %100, %104 : vector<8x128xf32>
    %106 = vector.extract_strided_slice %84 {offsets = [1, 8], sizes = [8, 64], strides = [1, 1]} : vector<10x80xf32> to vector<8x64xf32>
    %c4_52 = arith.constant 4 : index
    %c0_53 = arith.constant 0 : index
    %c0_54 = arith.constant 0 : index
    %107 = vector.load %arg4[%c4_52, %c0_53, %c0_54] : memref<9x64x128xf32, #tpu.memory_space<vmem>>, vector<1x64x128xf32>
    %108 = vector.shape_cast %107 : vector<1x64x128xf32> to vector<64x128xf32>
    %cst_55 = arith.constant dense<0.000000e+00> : vector<8x128xf32>
    %109 = tpu.matmul %106, %108, %cst_55 {dimension_numbers = #tpu.dot_dimension_numbers<[1], [0], [0], [1], [0, 0, 1, 1], [], []>} : vector<8x64xf32>, vector<64x128xf32>, vector<8x128xf32> -> vector<8x128xf32>
    %110 = arith.addf %105, %109 : vector<8x128xf32>
    %111 = vector.extract_strided_slice %84 {offsets = [1, 16], sizes = [8, 64], strides = [1, 1]} : vector<10x80xf32> to vector<8x64xf32>
    %c5_56 = arith.constant 5 : index
    %c0_57 = arith.constant 0 : index
    %c0_58 = arith.constant 0 : index
    %112 = vector.load %arg4[%c5_56, %c0_57, %c0_58] : memref<9x64x128xf32, #tpu.memory_space<vmem>>, vector<1x64x128xf32>
    %113 = vector.shape_cast %112 : vector<1x64x128xf32> to vector<64x128xf32>
    %cst_59 = arith.constant dense<0.000000e+00> : vector<8x128xf32>
    %114 = tpu.matmul %111, %113, %cst_59 {dimension_numbers = #tpu.dot_dimension_numbers<[1], [0], [0], [1], [0, 0, 1, 1], [], []>} : vector<8x64xf32>, vector<64x128xf32>, vector<8x128xf32> -> vector<8x128xf32>
    %115 = arith.addf %110, %114 : vector<8x128xf32>
    %116 = vector.extract_strided_slice %84 {offsets = [2, 0], sizes = [8, 64], strides = [1, 1]} : vector<10x80xf32> to vector<8x64xf32>
    %c6_60 = arith.constant 6 : index
    %c0_61 = arith.constant 0 : index
    %c0_62 = arith.constant 0 : index
    %117 = vector.load %arg4[%c6_60, %c0_61, %c0_62] : memref<9x64x128xf32, #tpu.memory_space<vmem>>, vector<1x64x128xf32>
    %118 = vector.shape_cast %117 : vector<1x64x128xf32> to vector<64x128xf32>
    %cst_63 = arith.constant dense<0.000000e+00> : vector<8x128xf32>
    %119 = tpu.matmul %116, %118, %cst_63 {dimension_numbers = #tpu.dot_dimension_numbers<[1], [0], [0], [1], [0, 0, 1, 1], [], []>} : vector<8x64xf32>, vector<64x128xf32>, vector<8x128xf32> -> vector<8x128xf32>
    %120 = arith.addf %115, %119 : vector<8x128xf32>
    %121 = vector.extract_strided_slice %84 {offsets = [2, 8], sizes = [8, 64], strides = [1, 1]} : vector<10x80xf32> to vector<8x64xf32>
    %c7_64 = arith.constant 7 : index
    %c0_65 = arith.constant 0 : index
    %c0_66 = arith.constant 0 : index
    %122 = vector.load %arg4[%c7_64, %c0_65, %c0_66] : memref<9x64x128xf32, #tpu.memory_space<vmem>>, vector<1x64x128xf32>
    %123 = vector.shape_cast %122 : vector<1x64x128xf32> to vector<64x128xf32>
    %cst_67 = arith.constant dense<0.000000e+00> : vector<8x128xf32>
    %124 = tpu.matmul %121, %123, %cst_67 {dimension_numbers = #tpu.dot_dimension_numbers<[1], [0], [0], [1], [0, 0, 1, 1], [], []>} : vector<8x64xf32>, vector<64x128xf32>, vector<8x128xf32> -> vector<8x128xf32>
    %125 = arith.addf %120, %124 : vector<8x128xf32>
    %126 = vector.extract_strided_slice %84 {offsets = [2, 16], sizes = [8, 64], strides = [1, 1]} : vector<10x80xf32> to vector<8x64xf32>
    %c8_68 = arith.constant 8 : index
    %c0_69 = arith.constant 0 : index
    %c0_70 = arith.constant 0 : index
    %127 = vector.load %arg4[%c8_68, %c0_69, %c0_70] : memref<9x64x128xf32, #tpu.memory_space<vmem>>, vector<1x64x128xf32>
    %128 = vector.shape_cast %127 : vector<1x64x128xf32> to vector<64x128xf32>
    %cst_71 = arith.constant dense<0.000000e+00> : vector<8x128xf32>
    %129 = tpu.matmul %126, %128, %cst_71 {dimension_numbers = #tpu.dot_dimension_numbers<[1], [0], [0], [1], [0, 0, 1, 1], [], []>} : vector<8x64xf32>, vector<64x128xf32>, vector<8x128xf32> -> vector<8x128xf32>
    %130 = arith.addf %125, %129 : vector<8x128xf32>
    %c0_72 = arith.constant 0 : index
    %c0_73 = arith.constant 0 : index
    %131 = vector.load %arg5[%c0_72, %c0_73] : memref<1x128xf32, #tpu.memory_space<vmem>>, vector<1x128xf32>
    %132 = vector.broadcast %131 : vector<1x128xf32> to vector<8x128xf32>
    %133 = arith.addf %130, %132 : vector<8x128xf32>
    %cst_74 = arith.constant 0.000000e+00 : f32
    %134 = vector.broadcast %cst_74 : f32 to vector<8x128xf32>
    %135 = arith.maximumf %133, %134 : vector<8x128xf32>
    %136 = vector.extract_strided_slice %135 {offsets = [0, 0], sizes = [8, 64], strides = [1, 1]} : vector<8x128xf32> to vector<8x64xf32>
    %137 = vector.extract_strided_slice %135 {offsets = [0, 64], sizes = [8, 64], strides = [1, 1]} : vector<8x128xf32> to vector<8x64xf32>
    %138 = arith.maximumf %136, %137 : vector<8x64xf32>
    %139 = vector.extract_strided_slice %138 {offsets = [0, 0], sizes = [1, 64], strides = [1, 1]} : vector<8x64xf32> to vector<1x64xf32>
    %140 = vector.extract_strided_slice %138 {offsets = [1, 0], sizes = [1, 64], strides = [1, 1]} : vector<8x64xf32> to vector<1x64xf32>
    %141 = arith.maximumf %139, %140 : vector<1x64xf32>
    %142 = vector.extract_strided_slice %138 {offsets = [2, 0], sizes = [1, 64], strides = [1, 1]} : vector<8x64xf32> to vector<1x64xf32>
    %143 = vector.extract_strided_slice %138 {offsets = [3, 0], sizes = [1, 64], strides = [1, 1]} : vector<8x64xf32> to vector<1x64xf32>
    %144 = arith.maximumf %142, %143 : vector<1x64xf32>
    %145 = vector.extract_strided_slice %138 {offsets = [4, 0], sizes = [1, 64], strides = [1, 1]} : vector<8x64xf32> to vector<1x64xf32>
    %146 = vector.extract_strided_slice %138 {offsets = [5, 0], sizes = [1, 64], strides = [1, 1]} : vector<8x64xf32> to vector<1x64xf32>
    %147 = arith.maximumf %145, %146 : vector<1x64xf32>
    %148 = vector.extract_strided_slice %138 {offsets = [6, 0], sizes = [1, 64], strides = [1, 1]} : vector<8x64xf32> to vector<1x64xf32>
    %149 = vector.extract_strided_slice %138 {offsets = [7, 0], sizes = [1, 64], strides = [1, 1]} : vector<8x64xf32> to vector<1x64xf32>
    %150 = arith.maximumf %148, %149 : vector<1x64xf32>
    %151 = tpu.concatenate %141, %144, %147, %150 in 0 : vector<1x64xf32>, vector<1x64xf32>, vector<1x64xf32>, vector<1x64xf32> -> vector<4x64xf32>
    %c1_75 = arith.constant 1 : index
    %c0_76 = arith.constant 0 : index
    %c0_77 = arith.constant 0 : index
    %152 = vector.load %arg1[%c1_75, %c0_76, %c0_77] : memref<2x18x54xf32, #tpu.memory_space<vmem>>, vector<1x18x54xf32>
    %153 = vector.shape_cast %152 : vector<1x18x54xf32> to vector<18x54xf32>
    %cst_78 = arith.constant 0.000000e+00 : f32
    %154 = vector.broadcast %cst_78 : f32 to vector<16x128xf32>
    %155 = vector.extract_strided_slice %153 {offsets = [0, 0], sizes = [16, 48], strides = [1, 1]} : vector<18x54xf32> to vector<16x48xf32>
    %c0_79 = arith.constant 0 : index
    %c0_80 = arith.constant 0 : index
    %c0_81 = arith.constant 0 : index
    %156 = vector.load %arg2[%c0_79, %c0_80, %c0_81] : memref<9x48x128xf32, #tpu.memory_space<vmem>>, vector<1x48x128xf32>
    %157 = vector.shape_cast %156 : vector<1x48x128xf32> to vector<48x128xf32>
    %cst_82 = arith.constant dense<0.000000e+00> : vector<16x128xf32>
    %158 = tpu.matmul %155, %157, %cst_82 {dimension_numbers = #tpu.dot_dimension_numbers<[1], [0], [0], [1], [0, 0, 1, 1], [], []>} : vector<16x48xf32>, vector<48x128xf32>, vector<16x128xf32> -> vector<16x128xf32>
    %159 = arith.addf %154, %158 : vector<16x128xf32>
    %160 = vector.extract_strided_slice %153 {offsets = [0, 3], sizes = [16, 48], strides = [1, 1]} : vector<18x54xf32> to vector<16x48xf32>
    %c1_83 = arith.constant 1 : index
    %c0_84 = arith.constant 0 : index
    %c0_85 = arith.constant 0 : index
    %161 = vector.load %arg2[%c1_83, %c0_84, %c0_85] : memref<9x48x128xf32, #tpu.memory_space<vmem>>, vector<1x48x128xf32>
    %162 = vector.shape_cast %161 : vector<1x48x128xf32> to vector<48x128xf32>
    %cst_86 = arith.constant dense<0.000000e+00> : vector<16x128xf32>
    %163 = tpu.matmul %160, %162, %cst_86 {dimension_numbers = #tpu.dot_dimension_numbers<[1], [0], [0], [1], [0, 0, 1, 1], [], []>} : vector<16x48xf32>, vector<48x128xf32>, vector<16x128xf32> -> vector<16x128xf32>
    %164 = arith.addf %159, %163 : vector<16x128xf32>
    %165 = vector.extract_strided_slice %153 {offsets = [0, 6], sizes = [16, 48], strides = [1, 1]} : vector<18x54xf32> to vector<16x48xf32>
    %c2_87 = arith.constant 2 : index
    %c0_88 = arith.constant 0 : index
    %c0_89 = arith.constant 0 : index
    %166 = vector.load %arg2[%c2_87, %c0_88, %c0_89] : memref<9x48x128xf32, #tpu.memory_space<vmem>>, vector<1x48x128xf32>
    %167 = vector.shape_cast %166 : vector<1x48x128xf32> to vector<48x128xf32>
    %cst_90 = arith.constant dense<0.000000e+00> : vector<16x128xf32>
    %168 = tpu.matmul %165, %167, %cst_90 {dimension_numbers = #tpu.dot_dimension_numbers<[1], [0], [0], [1], [0, 0, 1, 1], [], []>} : vector<16x48xf32>, vector<48x128xf32>, vector<16x128xf32> -> vector<16x128xf32>
    %169 = arith.addf %164, %168 : vector<16x128xf32>
    %170 = vector.extract_strided_slice %153 {offsets = [1, 0], sizes = [16, 48], strides = [1, 1]} : vector<18x54xf32> to vector<16x48xf32>
    %c3_91 = arith.constant 3 : index
    %c0_92 = arith.constant 0 : index
    %c0_93 = arith.constant 0 : index
    %171 = vector.load %arg2[%c3_91, %c0_92, %c0_93] : memref<9x48x128xf32, #tpu.memory_space<vmem>>, vector<1x48x128xf32>
    %172 = vector.shape_cast %171 : vector<1x48x128xf32> to vector<48x128xf32>
    %cst_94 = arith.constant dense<0.000000e+00> : vector<16x128xf32>
    %173 = tpu.matmul %170, %172, %cst_94 {dimension_numbers = #tpu.dot_dimension_numbers<[1], [0], [0], [1], [0, 0, 1, 1], [], []>} : vector<16x48xf32>, vector<48x128xf32>, vector<16x128xf32> -> vector<16x128xf32>
    %174 = arith.addf %169, %173 : vector<16x128xf32>
    %175 = vector.extract_strided_slice %153 {offsets = [1, 3], sizes = [16, 48], strides = [1, 1]} : vector<18x54xf32> to vector<16x48xf32>
    %c4_95 = arith.constant 4 : index
    %c0_96 = arith.constant 0 : index
    %c0_97 = arith.constant 0 : index
    %176 = vector.load %arg2[%c4_95, %c0_96, %c0_97] : memref<9x48x128xf32, #tpu.memory_space<vmem>>, vector<1x48x128xf32>
    %177 = vector.shape_cast %176 : vector<1x48x128xf32> to vector<48x128xf32>
    %cst_98 = arith.constant dense<0.000000e+00> : vector<16x128xf32>
    %178 = tpu.matmul %175, %177, %cst_98 {dimension_numbers = #tpu.dot_dimension_numbers<[1], [0], [0], [1], [0, 0, 1, 1], [], []>} : vector<16x48xf32>, vector<48x128xf32>, vector<16x128xf32> -> vector<16x128xf32>
    %179 = arith.addf %174, %178 : vector<16x128xf32>
    %180 = vector.extract_strided_slice %153 {offsets = [1, 6], sizes = [16, 48], strides = [1, 1]} : vector<18x54xf32> to vector<16x48xf32>
    %c5_99 = arith.constant 5 : index
    %c0_100 = arith.constant 0 : index
    %c0_101 = arith.constant 0 : index
    %181 = vector.load %arg2[%c5_99, %c0_100, %c0_101] : memref<9x48x128xf32, #tpu.memory_space<vmem>>, vector<1x48x128xf32>
    %182 = vector.shape_cast %181 : vector<1x48x128xf32> to vector<48x128xf32>
    %cst_102 = arith.constant dense<0.000000e+00> : vector<16x128xf32>
    %183 = tpu.matmul %180, %182, %cst_102 {dimension_numbers = #tpu.dot_dimension_numbers<[1], [0], [0], [1], [0, 0, 1, 1], [], []>} : vector<16x48xf32>, vector<48x128xf32>, vector<16x128xf32> -> vector<16x128xf32>
    %184 = arith.addf %179, %183 : vector<16x128xf32>
    %185 = vector.extract_strided_slice %153 {offsets = [2, 0], sizes = [16, 48], strides = [1, 1]} : vector<18x54xf32> to vector<16x48xf32>
    %c6_103 = arith.constant 6 : index
    %c0_104 = arith.constant 0 : index
    %c0_105 = arith.constant 0 : index
    %186 = vector.load %arg2[%c6_103, %c0_104, %c0_105] : memref<9x48x128xf32, #tpu.memory_space<vmem>>, vector<1x48x128xf32>
    %187 = vector.shape_cast %186 : vector<1x48x128xf32> to vector<48x128xf32>
    %cst_106 = arith.constant dense<0.000000e+00> : vector<16x128xf32>
    %188 = tpu.matmul %185, %187, %cst_106 {dimension_numbers = #tpu.dot_dimension_numbers<[1], [0], [0], [1], [0, 0, 1, 1], [], []>} : vector<16x48xf32>, vector<48x128xf32>, vector<16x128xf32> -> vector<16x128xf32>
    %189 = arith.addf %184, %188 : vector<16x128xf32>
    %190 = vector.extract_strided_slice %153 {offsets = [2, 3], sizes = [16, 48], strides = [1, 1]} : vector<18x54xf32> to vector<16x48xf32>
    %c7_107 = arith.constant 7 : index
    %c0_108 = arith.constant 0 : index
    %c0_109 = arith.constant 0 : index
    %191 = vector.load %arg2[%c7_107, %c0_108, %c0_109] : memref<9x48x128xf32, #tpu.memory_space<vmem>>, vector<1x48x128xf32>
    %192 = vector.shape_cast %191 : vector<1x48x128xf32> to vector<48x128xf32>
    %cst_110 = arith.constant dense<0.000000e+00> : vector<16x128xf32>
    %193 = tpu.matmul %190, %192, %cst_110 {dimension_numbers = #tpu.dot_dimension_numbers<[1], [0], [0], [1], [0, 0, 1, 1], [], []>} : vector<16x48xf32>, vector<48x128xf32>, vector<16x128xf32> -> vector<16x128xf32>
    %194 = arith.addf %189, %193 : vector<16x128xf32>
    %195 = vector.extract_strided_slice %153 {offsets = [2, 6], sizes = [16, 48], strides = [1, 1]} : vector<18x54xf32> to vector<16x48xf32>
    %c8_111 = arith.constant 8 : index
    %c0_112 = arith.constant 0 : index
    %c0_113 = arith.constant 0 : index
    %196 = vector.load %arg2[%c8_111, %c0_112, %c0_113] : memref<9x48x128xf32, #tpu.memory_space<vmem>>, vector<1x48x128xf32>
    %197 = vector.shape_cast %196 : vector<1x48x128xf32> to vector<48x128xf32>
    %cst_114 = arith.constant dense<0.000000e+00> : vector<16x128xf32>
    %198 = tpu.matmul %195, %197, %cst_114 {dimension_numbers = #tpu.dot_dimension_numbers<[1], [0], [0], [1], [0, 0, 1, 1], [], []>} : vector<16x48xf32>, vector<48x128xf32>, vector<16x128xf32> -> vector<16x128xf32>
    %199 = arith.addf %194, %198 : vector<16x128xf32>
    %c0_115 = arith.constant 0 : index
    %c0_116 = arith.constant 0 : index
    %200 = vector.load %arg3[%c0_115, %c0_116] : memref<1x128xf32, #tpu.memory_space<vmem>>, vector<1x128xf32>
    %201 = vector.broadcast %200 : vector<1x128xf32> to vector<16x128xf32>
    %202 = arith.addf %199, %201 : vector<16x128xf32>
    %cst_117 = arith.constant 0.000000e+00 : f32
    %203 = vector.broadcast %cst_117 : f32 to vector<16x128xf32>
    %204 = arith.maximumf %202, %203 : vector<16x128xf32>
    %205 = vector.extract_strided_slice %204 {offsets = [0, 0], sizes = [16, 64], strides = [1, 1]} : vector<16x128xf32> to vector<16x64xf32>
    %206 = vector.extract_strided_slice %204 {offsets = [0, 64], sizes = [16, 64], strides = [1, 1]} : vector<16x128xf32> to vector<16x64xf32>
    %207 = arith.maximumf %205, %206 : vector<16x64xf32>
    %208 = vector.extract_strided_slice %207 {offsets = [0, 0], sizes = [1, 64], strides = [1, 1]} : vector<16x64xf32> to vector<1x64xf32>
    %209 = vector.extract_strided_slice %207 {offsets = [1, 0], sizes = [1, 64], strides = [1, 1]} : vector<16x64xf32> to vector<1x64xf32>
    %210 = arith.maximumf %208, %209 : vector<1x64xf32>
    %211 = vector.extract_strided_slice %207 {offsets = [2, 0], sizes = [1, 64], strides = [1, 1]} : vector<16x64xf32> to vector<1x64xf32>
    %212 = vector.extract_strided_slice %207 {offsets = [3, 0], sizes = [1, 64], strides = [1, 1]} : vector<16x64xf32> to vector<1x64xf32>
    %213 = arith.maximumf %211, %212 : vector<1x64xf32>
    %214 = vector.extract_strided_slice %207 {offsets = [4, 0], sizes = [1, 64], strides = [1, 1]} : vector<16x64xf32> to vector<1x64xf32>
    %215 = vector.extract_strided_slice %207 {offsets = [5, 0], sizes = [1, 64], strides = [1, 1]} : vector<16x64xf32> to vector<1x64xf32>
    %216 = arith.maximumf %214, %215 : vector<1x64xf32>
    %217 = vector.extract_strided_slice %207 {offsets = [6, 0], sizes = [1, 64], strides = [1, 1]} : vector<16x64xf32> to vector<1x64xf32>
    %218 = vector.extract_strided_slice %207 {offsets = [7, 0], sizes = [1, 64], strides = [1, 1]} : vector<16x64xf32> to vector<1x64xf32>
    %219 = arith.maximumf %217, %218 : vector<1x64xf32>
    %220 = vector.extract_strided_slice %207 {offsets = [8, 0], sizes = [1, 64], strides = [1, 1]} : vector<16x64xf32> to vector<1x64xf32>
    %221 = vector.extract_strided_slice %207 {offsets = [9, 0], sizes = [1, 64], strides = [1, 1]} : vector<16x64xf32> to vector<1x64xf32>
    %222 = arith.maximumf %220, %221 : vector<1x64xf32>
    %223 = vector.extract_strided_slice %207 {offsets = [10, 0], sizes = [1, 64], strides = [1, 1]} : vector<16x64xf32> to vector<1x64xf32>
    %224 = vector.extract_strided_slice %207 {offsets = [11, 0], sizes = [1, 64], strides = [1, 1]} : vector<16x64xf32> to vector<1x64xf32>
    %225 = arith.maximumf %223, %224 : vector<1x64xf32>
    %226 = vector.extract_strided_slice %207 {offsets = [12, 0], sizes = [1, 64], strides = [1, 1]} : vector<16x64xf32> to vector<1x64xf32>
    %227 = vector.extract_strided_slice %207 {offsets = [13, 0], sizes = [1, 64], strides = [1, 1]} : vector<16x64xf32> to vector<1x64xf32>
    %228 = arith.maximumf %226, %227 : vector<1x64xf32>
    %229 = vector.extract_strided_slice %207 {offsets = [14, 0], sizes = [1, 64], strides = [1, 1]} : vector<16x64xf32> to vector<1x64xf32>
    %230 = vector.extract_strided_slice %207 {offsets = [15, 0], sizes = [1, 64], strides = [1, 1]} : vector<16x64xf32> to vector<1x64xf32>
    %231 = arith.maximumf %229, %230 : vector<1x64xf32>
    %232 = tpu.concatenate %210, %213, %216, %219, %222, %225, %228, %231 in 0 : vector<1x64xf32>, vector<1x64xf32>, vector<1x64xf32>, vector<1x64xf32>, vector<1x64xf32>, vector<1x64xf32>, vector<1x64xf32>, vector<1x64xf32> -> vector<8x64xf32>
    %cst_118 = arith.constant 0.000000e+00 : f32
    %233 = vector.broadcast %cst_118 : f32 to vector<8x8xf32>
    %cst_119 = arith.constant 0.000000e+00 : f32
    %234 = vector.broadcast %cst_119 : f32 to vector<1x80xf32>
    %235 = tpu.concatenate %233, %232, %233 in 1 : vector<8x8xf32>, vector<8x64xf32>, vector<8x8xf32> -> vector<8x80xf32>
    %236 = tpu.concatenate %234, %235, %234 in 0 : vector<1x80xf32>, vector<8x80xf32>, vector<1x80xf32> -> vector<10x80xf32>
    %cst_120 = arith.constant 0.000000e+00 : f32
    %237 = vector.broadcast %cst_120 : f32 to vector<8x128xf32>
    %238 = vector.extract_strided_slice %236 {offsets = [0, 0], sizes = [8, 64], strides = [1, 1]} : vector<10x80xf32> to vector<8x64xf32>
    %c0_121 = arith.constant 0 : index
    %c0_122 = arith.constant 0 : index
    %c0_123 = arith.constant 0 : index
    %239 = vector.load %arg4[%c0_121, %c0_122, %c0_123] : memref<9x64x128xf32, #tpu.memory_space<vmem>>, vector<1x64x128xf32>
    %240 = vector.shape_cast %239 : vector<1x64x128xf32> to vector<64x128xf32>
    %cst_124 = arith.constant dense<0.000000e+00> : vector<8x128xf32>
    %241 = tpu.matmul %238, %240, %cst_124 {dimension_numbers = #tpu.dot_dimension_numbers<[1], [0], [0], [1], [0, 0, 1, 1], [], []>} : vector<8x64xf32>, vector<64x128xf32>, vector<8x128xf32> -> vector<8x128xf32>
    %242 = arith.addf %237, %241 : vector<8x128xf32>
    %243 = vector.extract_strided_slice %236 {offsets = [0, 8], sizes = [8, 64], strides = [1, 1]} : vector<10x80xf32> to vector<8x64xf32>
    %c1_125 = arith.constant 1 : index
    %c0_126 = arith.constant 0 : index
    %c0_127 = arith.constant 0 : index
    %244 = vector.load %arg4[%c1_125, %c0_126, %c0_127] : memref<9x64x128xf32, #tpu.memory_space<vmem>>, vector<1x64x128xf32>
    %245 = vector.shape_cast %244 : vector<1x64x128xf32> to vector<64x128xf32>
    %cst_128 = arith.constant dense<0.000000e+00> : vector<8x128xf32>
    %246 = tpu.matmul %243, %245, %cst_128 {dimension_numbers = #tpu.dot_dimension_numbers<[1], [0], [0], [1], [0, 0, 1, 1], [], []>} : vector<8x64xf32>, vector<64x128xf32>, vector<8x128xf32> -> vector<8x128xf32>
    %247 = arith.addf %242, %246 : vector<8x128xf32>
    %248 = vector.extract_strided_slice %236 {offsets = [0, 16], sizes = [8, 64], strides = [1, 1]} : vector<10x80xf32> to vector<8x64xf32>
    %c2_129 = arith.constant 2 : index
    %c0_130 = arith.constant 0 : index
    %c0_131 = arith.constant 0 : index
    %249 = vector.load %arg4[%c2_129, %c0_130, %c0_131] : memref<9x64x128xf32, #tpu.memory_space<vmem>>, vector<1x64x128xf32>
    %250 = vector.shape_cast %249 : vector<1x64x128xf32> to vector<64x128xf32>
    %cst_132 = arith.constant dense<0.000000e+00> : vector<8x128xf32>
    %251 = tpu.matmul %248, %250, %cst_132 {dimension_numbers = #tpu.dot_dimension_numbers<[1], [0], [0], [1], [0, 0, 1, 1], [], []>} : vector<8x64xf32>, vector<64x128xf32>, vector<8x128xf32> -> vector<8x128xf32>
    %252 = arith.addf %247, %251 : vector<8x128xf32>
    %253 = vector.extract_strided_slice %236 {offsets = [1, 0], sizes = [8, 64], strides = [1, 1]} : vector<10x80xf32> to vector<8x64xf32>
    %c3_133 = arith.constant 3 : index
    %c0_134 = arith.constant 0 : index
    %c0_135 = arith.constant 0 : index
    %254 = vector.load %arg4[%c3_133, %c0_134, %c0_135] : memref<9x64x128xf32, #tpu.memory_space<vmem>>, vector<1x64x128xf32>
    %255 = vector.shape_cast %254 : vector<1x64x128xf32> to vector<64x128xf32>
    %cst_136 = arith.constant dense<0.000000e+00> : vector<8x128xf32>
    %256 = tpu.matmul %253, %255, %cst_136 {dimension_numbers = #tpu.dot_dimension_numbers<[1], [0], [0], [1], [0, 0, 1, 1], [], []>} : vector<8x64xf32>, vector<64x128xf32>, vector<8x128xf32> -> vector<8x128xf32>
    %257 = arith.addf %252, %256 : vector<8x128xf32>
    %258 = vector.extract_strided_slice %236 {offsets = [1, 8], sizes = [8, 64], strides = [1, 1]} : vector<10x80xf32> to vector<8x64xf32>
    %c4_137 = arith.constant 4 : index
    %c0_138 = arith.constant 0 : index
    %c0_139 = arith.constant 0 : index
    %259 = vector.load %arg4[%c4_137, %c0_138, %c0_139] : memref<9x64x128xf32, #tpu.memory_space<vmem>>, vector<1x64x128xf32>
    %260 = vector.shape_cast %259 : vector<1x64x128xf32> to vector<64x128xf32>
    %cst_140 = arith.constant dense<0.000000e+00> : vector<8x128xf32>
    %261 = tpu.matmul %258, %260, %cst_140 {dimension_numbers = #tpu.dot_dimension_numbers<[1], [0], [0], [1], [0, 0, 1, 1], [], []>} : vector<8x64xf32>, vector<64x128xf32>, vector<8x128xf32> -> vector<8x128xf32>
    %262 = arith.addf %257, %261 : vector<8x128xf32>
    %263 = vector.extract_strided_slice %236 {offsets = [1, 16], sizes = [8, 64], strides = [1, 1]} : vector<10x80xf32> to vector<8x64xf32>
    %c5_141 = arith.constant 5 : index
    %c0_142 = arith.constant 0 : index
    %c0_143 = arith.constant 0 : index
    %264 = vector.load %arg4[%c5_141, %c0_142, %c0_143] : memref<9x64x128xf32, #tpu.memory_space<vmem>>, vector<1x64x128xf32>
    %265 = vector.shape_cast %264 : vector<1x64x128xf32> to vector<64x128xf32>
    %cst_144 = arith.constant dense<0.000000e+00> : vector<8x128xf32>
    %266 = tpu.matmul %263, %265, %cst_144 {dimension_numbers = #tpu.dot_dimension_numbers<[1], [0], [0], [1], [0, 0, 1, 1], [], []>} : vector<8x64xf32>, vector<64x128xf32>, vector<8x128xf32> -> vector<8x128xf32>
    %267 = arith.addf %262, %266 : vector<8x128xf32>
    %268 = vector.extract_strided_slice %236 {offsets = [2, 0], sizes = [8, 64], strides = [1, 1]} : vector<10x80xf32> to vector<8x64xf32>
    %c6_145 = arith.constant 6 : index
    %c0_146 = arith.constant 0 : index
    %c0_147 = arith.constant 0 : index
    %269 = vector.load %arg4[%c6_145, %c0_146, %c0_147] : memref<9x64x128xf32, #tpu.memory_space<vmem>>, vector<1x64x128xf32>
    %270 = vector.shape_cast %269 : vector<1x64x128xf32> to vector<64x128xf32>
    %cst_148 = arith.constant dense<0.000000e+00> : vector<8x128xf32>
    %271 = tpu.matmul %268, %270, %cst_148 {dimension_numbers = #tpu.dot_dimension_numbers<[1], [0], [0], [1], [0, 0, 1, 1], [], []>} : vector<8x64xf32>, vector<64x128xf32>, vector<8x128xf32> -> vector<8x128xf32>
    %272 = arith.addf %267, %271 : vector<8x128xf32>
    %273 = vector.extract_strided_slice %236 {offsets = [2, 8], sizes = [8, 64], strides = [1, 1]} : vector<10x80xf32> to vector<8x64xf32>
    %c7_149 = arith.constant 7 : index
    %c0_150 = arith.constant 0 : index
    %c0_151 = arith.constant 0 : index
    %274 = vector.load %arg4[%c7_149, %c0_150, %c0_151] : memref<9x64x128xf32, #tpu.memory_space<vmem>>, vector<1x64x128xf32>
    %275 = vector.shape_cast %274 : vector<1x64x128xf32> to vector<64x128xf32>
    %cst_152 = arith.constant dense<0.000000e+00> : vector<8x128xf32>
    %276 = tpu.matmul %273, %275, %cst_152 {dimension_numbers = #tpu.dot_dimension_numbers<[1], [0], [0], [1], [0, 0, 1, 1], [], []>} : vector<8x64xf32>, vector<64x128xf32>, vector<8x128xf32> -> vector<8x128xf32>
    %277 = arith.addf %272, %276 : vector<8x128xf32>
    %278 = vector.extract_strided_slice %236 {offsets = [2, 16], sizes = [8, 64], strides = [1, 1]} : vector<10x80xf32> to vector<8x64xf32>
    %c8_153 = arith.constant 8 : index
    %c0_154 = arith.constant 0 : index
    %c0_155 = arith.constant 0 : index
    %279 = vector.load %arg4[%c8_153, %c0_154, %c0_155] : memref<9x64x128xf32, #tpu.memory_space<vmem>>, vector<1x64x128xf32>
    %280 = vector.shape_cast %279 : vector<1x64x128xf32> to vector<64x128xf32>
    %cst_156 = arith.constant dense<0.000000e+00> : vector<8x128xf32>
    %281 = tpu.matmul %278, %280, %cst_156 {dimension_numbers = #tpu.dot_dimension_numbers<[1], [0], [0], [1], [0, 0, 1, 1], [], []>} : vector<8x64xf32>, vector<64x128xf32>, vector<8x128xf32> -> vector<8x128xf32>
    %282 = arith.addf %277, %281 : vector<8x128xf32>
    %c0_157 = arith.constant 0 : index
    %c0_158 = arith.constant 0 : index
    %283 = vector.load %arg5[%c0_157, %c0_158] : memref<1x128xf32, #tpu.memory_space<vmem>>, vector<1x128xf32>
    %284 = vector.broadcast %283 : vector<1x128xf32> to vector<8x128xf32>
    %285 = arith.addf %282, %284 : vector<8x128xf32>
    %cst_159 = arith.constant 0.000000e+00 : f32
    %286 = vector.broadcast %cst_159 : f32 to vector<8x128xf32>
    %287 = arith.maximumf %285, %286 : vector<8x128xf32>
    %288 = vector.extract_strided_slice %287 {offsets = [0, 0], sizes = [8, 64], strides = [1, 1]} : vector<8x128xf32> to vector<8x64xf32>
    %289 = vector.extract_strided_slice %287 {offsets = [0, 64], sizes = [8, 64], strides = [1, 1]} : vector<8x128xf32> to vector<8x64xf32>
    %290 = arith.maximumf %288, %289 : vector<8x64xf32>
    %291 = vector.extract_strided_slice %290 {offsets = [0, 0], sizes = [1, 64], strides = [1, 1]} : vector<8x64xf32> to vector<1x64xf32>
    %292 = vector.extract_strided_slice %290 {offsets = [1, 0], sizes = [1, 64], strides = [1, 1]} : vector<8x64xf32> to vector<1x64xf32>
    %293 = arith.maximumf %291, %292 : vector<1x64xf32>
    %294 = vector.extract_strided_slice %290 {offsets = [2, 0], sizes = [1, 64], strides = [1, 1]} : vector<8x64xf32> to vector<1x64xf32>
    %295 = vector.extract_strided_slice %290 {offsets = [3, 0], sizes = [1, 64], strides = [1, 1]} : vector<8x64xf32> to vector<1x64xf32>
    %296 = arith.maximumf %294, %295 : vector<1x64xf32>
    %297 = vector.extract_strided_slice %290 {offsets = [4, 0], sizes = [1, 64], strides = [1, 1]} : vector<8x64xf32> to vector<1x64xf32>
    %298 = vector.extract_strided_slice %290 {offsets = [5, 0], sizes = [1, 64], strides = [1, 1]} : vector<8x64xf32> to vector<1x64xf32>
    %299 = arith.maximumf %297, %298 : vector<1x64xf32>
    %300 = vector.extract_strided_slice %290 {offsets = [6, 0], sizes = [1, 64], strides = [1, 1]} : vector<8x64xf32> to vector<1x64xf32>
    %301 = vector.extract_strided_slice %290 {offsets = [7, 0], sizes = [1, 64], strides = [1, 1]} : vector<8x64xf32> to vector<1x64xf32>
    %302 = arith.maximumf %300, %301 : vector<1x64xf32>
    %303 = tpu.concatenate %293, %296, %299, %302 in 0 : vector<1x64xf32>, vector<1x64xf32>, vector<1x64xf32>, vector<1x64xf32> -> vector<4x64xf32>
    %cst_160 = arith.constant 0.000000e+00 : f32
    %304 = vector.broadcast %cst_160 : f32 to vector<2x10xf32>
    %305 = vector.extract_strided_slice %151 {offsets = [0, 0], sizes = [1, 64], strides = [1, 1]} : vector<4x64xf32> to vector<1x64xf32>
    %306 = vector.extract_strided_slice %303 {offsets = [0, 0], sizes = [1, 64], strides = [1, 1]} : vector<4x64xf32> to vector<1x64xf32>
    %307 = tpu.concatenate %305, %306 in 0 : vector<1x64xf32>, vector<1x64xf32> -> vector<2x64xf32>
    %c0_161 = arith.constant 0 : index
    %c0_162 = arith.constant 0 : index
    %c0_163 = arith.constant 0 : index
    %308 = vector.load %arg6[%c0_161, %c0_162, %c0_163] : memref<4x64x10xf32, #tpu.memory_space<vmem>>, vector<1x64x10xf32>
    %309 = vector.shape_cast %308 : vector<1x64x10xf32> to vector<64x10xf32>
    %cst_164 = arith.constant dense<0.000000e+00> : vector<2x10xf32>
    %310 = tpu.matmul %307, %309, %cst_164 {dimension_numbers = #tpu.dot_dimension_numbers<[1], [0], [0], [1], [0, 0, 1, 1], [], []>} : vector<2x64xf32>, vector<64x10xf32>, vector<2x10xf32> -> vector<2x10xf32>
    %311 = arith.addf %304, %310 : vector<2x10xf32>
    %312 = vector.extract_strided_slice %151 {offsets = [1, 0], sizes = [1, 64], strides = [1, 1]} : vector<4x64xf32> to vector<1x64xf32>
    %313 = vector.extract_strided_slice %303 {offsets = [1, 0], sizes = [1, 64], strides = [1, 1]} : vector<4x64xf32> to vector<1x64xf32>
    %314 = tpu.concatenate %312, %313 in 0 : vector<1x64xf32>, vector<1x64xf32> -> vector<2x64xf32>
    %c1_165 = arith.constant 1 : index
    %c0_166 = arith.constant 0 : index
    %c0_167 = arith.constant 0 : index
    %315 = vector.load %arg6[%c1_165, %c0_166, %c0_167] : memref<4x64x10xf32, #tpu.memory_space<vmem>>, vector<1x64x10xf32>
    %316 = vector.shape_cast %315 : vector<1x64x10xf32> to vector<64x10xf32>
    %cst_168 = arith.constant dense<0.000000e+00> : vector<2x10xf32>
    %317 = tpu.matmul %314, %316, %cst_168 {dimension_numbers = #tpu.dot_dimension_numbers<[1], [0], [0], [1], [0, 0, 1, 1], [], []>} : vector<2x64xf32>, vector<64x10xf32>, vector<2x10xf32> -> vector<2x10xf32>
    %318 = arith.addf %311, %317 : vector<2x10xf32>
    %319 = vector.extract_strided_slice %151 {offsets = [2, 0], sizes = [1, 64], strides = [1, 1]} : vector<4x64xf32> to vector<1x64xf32>
    %320 = vector.extract_strided_slice %303 {offsets = [2, 0], sizes = [1, 64], strides = [1, 1]} : vector<4x64xf32> to vector<1x64xf32>
    %321 = tpu.concatenate %319, %320 in 0 : vector<1x64xf32>, vector<1x64xf32> -> vector<2x64xf32>
    %c2_169 = arith.constant 2 : index
    %c0_170 = arith.constant 0 : index
    %c0_171 = arith.constant 0 : index
    %322 = vector.load %arg6[%c2_169, %c0_170, %c0_171] : memref<4x64x10xf32, #tpu.memory_space<vmem>>, vector<1x64x10xf32>
    %323 = vector.shape_cast %322 : vector<1x64x10xf32> to vector<64x10xf32>
    %cst_172 = arith.constant dense<0.000000e+00> : vector<2x10xf32>
    %324 = tpu.matmul %321, %323, %cst_172 {dimension_numbers = #tpu.dot_dimension_numbers<[1], [0], [0], [1], [0, 0, 1, 1], [], []>} : vector<2x64xf32>, vector<64x10xf32>, vector<2x10xf32> -> vector<2x10xf32>
    %325 = arith.addf %318, %324 : vector<2x10xf32>
    %326 = vector.extract_strided_slice %151 {offsets = [3, 0], sizes = [1, 64], strides = [1, 1]} : vector<4x64xf32> to vector<1x64xf32>
    %327 = vector.extract_strided_slice %303 {offsets = [3, 0], sizes = [1, 64], strides = [1, 1]} : vector<4x64xf32> to vector<1x64xf32>
    %328 = tpu.concatenate %326, %327 in 0 : vector<1x64xf32>, vector<1x64xf32> -> vector<2x64xf32>
    %c3_173 = arith.constant 3 : index
    %c0_174 = arith.constant 0 : index
    %c0_175 = arith.constant 0 : index
    %329 = vector.load %arg6[%c3_173, %c0_174, %c0_175] : memref<4x64x10xf32, #tpu.memory_space<vmem>>, vector<1x64x10xf32>
    %330 = vector.shape_cast %329 : vector<1x64x10xf32> to vector<64x10xf32>
    %cst_176 = arith.constant dense<0.000000e+00> : vector<2x10xf32>
    %331 = tpu.matmul %328, %330, %cst_176 {dimension_numbers = #tpu.dot_dimension_numbers<[1], [0], [0], [1], [0, 0, 1, 1], [], []>} : vector<2x64xf32>, vector<64x10xf32>, vector<2x10xf32> -> vector<2x10xf32>
    %332 = arith.addf %325, %331 : vector<2x10xf32>
    %c0_177 = arith.constant 0 : index
    %c0_178 = arith.constant 0 : index
    %333 = vector.load %arg7[%c0_177, %c0_178] : memref<1x10xf32, #tpu.memory_space<vmem>>, vector<1x10xf32>
    %334 = vector.broadcast %333 : vector<1x10xf32> to vector<2x10xf32>
    %335 = arith.addf %332, %334 : vector<2x10xf32>
    %c0_179 = arith.constant 0 : index
    %c0_180 = arith.constant 0 : index
    %336 = vector.load %arg8[%c0_179, %c0_180] : memref<2x10xf32, #tpu.memory_space<vmem>>, vector<2x10xf32>
    tpu.vector_store %arg8[%c0_179, %c0_180], %335 {strides = array<i32>} : memref<2x10xf32, #tpu.memory_space<vmem>>, vector<2x10xf32>,
    return
  }
  func.func @transform_0(%arg0: i32) -> (i32, i32, i32) {
    %c0_i32 = arith.constant 0 : i32
    %c0_i32_0 = arith.constant 0 : i32
    %c0_i32_1 = arith.constant 0 : i32
    %c0_i32_2 = arith.constant 0 : i32
    return %c0_i32, %c0_i32_0, %c0_i32_1 : i32, i32, i32
  }
  func.func @transform_1(%arg0: i32) -> (i32, i32, i32) {
    %c0_i32 = arith.constant 0 : i32
    %c0_i32_0 = arith.constant 0 : i32
    %c0_i32_1 = arith.constant 0 : i32
    %c0_i32_2 = arith.constant 0 : i32
    return %c0_i32, %c0_i32_0, %c0_i32_1 : i32, i32, i32
  }
  func.func @transform_2(%arg0: i32) -> (i32, i32) {
    %c0_i32 = arith.constant 0 : i32
    %c0_i32_0 = arith.constant 0 : i32
    %c0_i32_1 = arith.constant 0 : i32
    return %c0_i32, %c0_i32_0 : i32, i32
  }
  func.func @transform_3(%arg0: i32) -> (i32, i32, i32) {
    %c0_i32 = arith.constant 0 : i32
    %c0_i32_0 = arith.constant 0 : i32
    %c0_i32_1 = arith.constant 0 : i32
    %c0_i32_2 = arith.constant 0 : i32
    return %c0_i32, %c0_i32_0, %c0_i32_1 : i32, i32, i32
  }
  func.func @transform_4(%arg0: i32) -> (i32, i32) {
    %c0_i32 = arith.constant 0 : i32
    %c0_i32_0 = arith.constant 0 : i32
    %c0_i32_1 = arith.constant 0 : i32
    return %c0_i32, %c0_i32_0 : i32, i32
  }
  func.func @transform_5(%arg0: i32) -> (i32, i32, i32) {
    %c0_i32 = arith.constant 0 : i32
    %c0_i32_0 = arith.constant 0 : i32
    %c0_i32_1 = arith.constant 0 : i32
    %c0_i32_2 = arith.constant 0 : i32
    return %c0_i32, %c0_i32_0, %c0_i32_1 : i32, i32, i32
  }
  func.func @transform_6(%arg0: i32) -> (i32, i32) {
    %c0_i32 = arith.constant 0 : i32
    %c0_i32_0 = arith.constant 0 : i32
    %c0_i32_1 = arith.constant 0 : i32
    return %c0_i32, %c0_i32_0 : i32, i32
  }
  func.func @transform_7(%arg0: i32) -> (i32, i32) {
    %c0_i32 = arith.constant 0 : i32
    %c0_i32_0 = arith.constant 0 : i32
    %c0_i32_1 = arith.constant 0 : i32
    return %c0_i32, %c0_i32_0 : i32, i32
  }
}

</mosaic_0001>

<bundles_post_ra>
// kernel: tpu_custom_call.1
= control target key start
LH: loop header
LB: loop body
LE: loop exit
PB: predicated region body
PF: predicated region fallthrough
CT: control target
= control target key end

     0   :  { %12 = vsyncpa [#allocation3], 0  ;;  %s6250_s0 = inlined_call_operand.vmem [shape: f32[2,18,54], index: 0, kind: input, shape index: {}]   ;;  %s6251_s1 = inlined_call_operand.hbm [shape: f32[9,48,128], index: 1, kind: input, shape index: {}]   ;;  %s6252_s2 = inlined_call_operand.vmem [shape: f32[1,128], index: 2, kind: input, shape index: {}]   ;;  %s6253_s3 = inlined_call_operand.hbm [shape: f32[9,64,128], index: 3, kind: input, shape index: {}]   ;;  %s6254_s4 = inlined_call_operand.vmem [shape: f32[1,128], index: 4, kind: input, shape index: {}]   ;;  %s6255_s5 = inlined_call_operand.vmem [shape: f32[4,64,10], index: 5, kind: input, shape index: {}]   ;;  %s6256_s6 = inlined_call_operand.vmem [shape: f32[1,10], index: 6, kind: input, shape index: {}]   ;;  %s6257_s7 = inlined_call_operand.hbm [shape: f32[2,10], index: 7, kind: output, shape index: {}]  }
   0x1   :  { %13 = vsyncpa [#allocation6], 0 }
   0x2   :  { %14 = vsyncpa [#allocation4], 0  ;;  %s5345_s24 = smov [#allocation2]   ;;  %s5273_s28 = scalar_lea.hbm %s6251_s1, 6912 }
   0x3   :  { %s22_s25 = sshll.u32 %s5345_s24, 4  ;;  %p5274_p0 = scmp.ne.s32.totalorder %s6251_s1, %s5273_s28  ;;  %s23_s25 = int_to_ptr.vmem [resolvable:$true] %s22_s25 }
   0x4   :  { %p5277_p1 = scmp.lt.u32.totalorder %s5273_s28, %s6251_s1 }
   0x6   :  { %p5279_p2 = pnand %p5277_p1, %p5274_p0 }
   0x8   :  { %5282 = shalt.err (!%p5279_p2)
}
   0x9   :  { %s5283_s10 = scalar_lea.vmem %s23_s25, 6912  ;;  %p5288_p4 = scmp.lt.s32.totalorder %s23_s25, %s23_s25 }
   0xa   :  { %p5284_p3 = scmp.ne.s32.totalorder %s23_s25, %s5283_s10  ;;  %p5289_p5 = scmp.lt.s32.totalorder %s5283_s10, %s5283_s10 }
   0xc   :  { %p5290_p6 = por %p5289_p5, %p5288_p4 }
   0xe   :  { %p5291_p7 = pnand %p5290_p6, %p5284_p3 }
  0x10   :  { %5294 = shalt.err (!%p5291_p7)
}
  0x11   :  { %s5346_s11 = smov 128   ;;  %s5347_s12 = smov 8  }
  0x12   :  { %28 = dma.hbm_to_vmem [thread:$0]  %s6251_s1, 6912, %s23_s25, [#allocation3], %s5346_s11, %s5346_s11, %s5347_s12  }
  0x13   :  { %s5348_s15 = smov [#allocation5]   ;;  %s5295_s19 = scalar_lea.hbm %s6253_s3, 9216 }
  0x14   :  { %s36_s16 = sshll.u32 %s5348_s15, 4  ;;  %p5296_p8 = scmp.ne.s32.totalorder %s6253_s3, %s5295_s19  ;;  %s37_s16 = int_to_ptr.vmem [resolvable:$true] %s36_s16 }
  0x15   :  { %p5299_p9 = scmp.lt.u32.totalorder %s5295_s19, %s6253_s3 }
  0x17   :  { %p5301_p10 = pnand %p5299_p9, %p5296_p8 }
  0x19   :  { %5304 = shalt.err (!%p5301_p10)
}
  0x1a   :  { %s5305_s24 = scalar_lea.vmem %s37_s16, 9216  ;;  %p5310_p12 = scmp.lt.s32.totalorder %s37_s16, %s37_s16 }
  0x1b   :  { %p5306_p11 = scmp.ne.s32.totalorder %s37_s16, %s5305_s24  ;;  %p5311_p13 = scmp.lt.s32.totalorder %s5305_s24, %s5305_s24 }
  0x1d   :  { %p5312_p0 = por %p5311_p13, %p5310_p12 }
  0x1f   :  { %p5313_p1 = pnand %p5312_p0, %p5306_p11 }
  0x21   :  { %5316 = shalt.err (!%p5313_p1)
}
  0x22   :  { %42 = dma.hbm_to_vmem [thread:$0]  %s6253_s3, 9216, %s37_s16, [#allocation6], %s5346_s11, %s5346_s11, %s5347_s12  }
  0x23   :  { %5339 = dma.done.wait [#allocation3], 6912  }
  0x24   :  { %5340 = vsyncadd [#allocation3], 4294960384 }
  0x25   :  { %5341 = dma.done.wait [#allocation6], 9216  }
  0x26   :  { %5342 = vsyncadd [#allocation6], 4294958080  ;;  %v55_v0 = vld [vmem:[%s6250_s0] sm:$0xff]  ;;  %v57_v1 = vld [vmem:[%s6250_s0 + $0x10] sm:$0x3]  ;;  %s5349_s30 = smov 125  }
  0x27   :  { %73 = vrot.lane.b32.xlu0 %v55_v0, %s5349_s30  ;;  %v5434_v2 = vld [vmem:[%s6250_s0 + $0x8] sm:$0xff]  ;;  %s5350_s3 = smov 122   ;;  %v65_v3 = vld [vmem:[#allocation2 + $0x30] sm:$0xff]  ;;  %v337_v5 = vrot.slane %v55_v0, 1  ;;  %v340_v7 = vrot.slane %v57_v1, 1  ;;  %v67_v9 = vld [vmem:[#allocation2 + $0x40] sm:$0xff] }
  0x28   :  { %243 = vrot.lane.b32.xlu1 %v55_v0, %s5350_s3  ;;  %v66_v4 = vld [vmem:[#allocation2 + $0x38] sm:$0xff]  ;;  %v338_v6 = vrot.slane %v5434_v2, 1  ;;  %v68_v10 = vld [vmem:[#allocation2 + $0x48] sm:$0xff]  ;;  %vm336_vm0 = vcmask 1046528   ;;  %v69_v12 = vld [vmem:[#allocation2 + $0x50] sm:$0xff]  ;;  %v615_v19 = vrot.slane %v55_v0, 2 }
  0x29   :  { %v5438_v8 = vpack.c.bf16 %v66_v4, %v65_v3  ;;  %v5440_v11 = vpack.c.bf16 %v68_v10, %v67_v9  ;;  %v70_v13 = vld [vmem:[#allocation2 + $0x58] sm:$0xff]  ;;  %v58_v17 = vld [vmem:[#allocation2] sm:$0xff]  ;;  %v59_v18 = vld [vmem:[#allocation2 + $0x8] sm:$0xff]  ;;  %v616_v20 = vrot.slane %v5434_v2, 2  ;;  %v618_v21 = vrot.slane %v57_v1, 2  ;;  %s5351_s13 = smov 64  }
  0x2a   :  { %v5448_v14 = vsel %vm336_vm0, %v337_v5, %v338_v6  ;;  %v5451_v15 = vsel %vm336_vm0, %v338_v6, %v340_v7  ;;  %v5455_v16 = vpack.c.bf16 %v70_v13, %v69_v12  ;;  %vm614_vm1 = vcmask 1045504   ;;  %v60_v26 = vld [vmem:[#allocation2 + $0x10] sm:$0xff]  ;;  %v61_v27 = vld [vmem:[#allocation2 + $0x18] sm:$0xff]  ;;  %v62_v30 = vld [vmem:[#allocation2 + $0x20] sm:$0xff]  ;;  %s5355_s17 = smov 120   ;;  %s5357_s28 = smov [#allocation7]  }
  0x2b   :  { %4749 = vmatprep.subr.bf16.mxu0 %v5438_v8  ;;  %75 = vrot.lane.b32.xlu0 %v5434_v2, %s5349_s30  ;;  %v5464_v22 = vpack.c.bf16 %v59_v18, %v58_v17  ;;  %v5471_v23 = vsel %vm614_vm1, %v615_v19, %v616_v20  ;;  %v5474_v24 = vsel %vm614_vm1, %v616_v20, %v618_v21  ;;  %vm77_vm2 = vcmask 392192   ;;  %v63_v31 = vld [vmem:[#allocation2 + $0x28] sm:$0xff]  ;;  %v237_v33 = vld [vmem:[#allocation2 + $0x60] sm:$0xff]  ;;  %v239_v36 = vld [vmem:[#allocation2 + $0x70] sm:$0xff]  ;;  %s3620_s29 = sshll.u32 %s5357_s28, 4  ;;  %s3621_s29 = int_to_ptr.vmem [resolvable:$true] %s3620_s29 }
  0x2c   :  { %245 = vrot.lane.b32.xlu1 %v5434_v2, %s5350_s3  ;;  %4751 = vmatpush3.bf16.msra.mxu0 %v5438_v8  ;;  %v5487_v28 = vpack.c.bf16 %v61_v27, %v60_v26  ;;  %v5493_v32 = vpack.c.bf16 %v63_v31, %v62_v30  ;;  %v238_v34 = vld [vmem:[#allocation2 + $0x68] sm:$0xff]  ;;  %v240_v37 = vld [vmem:[#allocation2 + $0x78] sm:$0xff]  ;;  %v241_v40 = vld [vmem:[#allocation2 + $0x80] sm:$0xff]  ;;  %vm930_vm3 = vcmask 1040384   ;;  %vm932_vm4 = vcmask 1041408   ;;  %p5322_p3 = scmp.lt.s32.totalorder %s3621_s29, %s3621_s29 }
  0x2d   :  { %4753 = vmatprep.subr.bf16.mxu0 %v5440_v11  ;;  %v5497_v35 = vpack.c.bf16 %v238_v34, %v237_v33  ;;  %v5501_v38 = vpack.c.bf16 %v240_v37, %v239_v36  ;;  %v242_v41 = vld [vmem:[#allocation2 + $0x88] sm:$0xff]  ;;  %v329_v43 = vld [vmem:[#allocation2 + $0x90] sm:$0xff]  ;;  %v330_v44 = vld [vmem:[#allocation2 + $0x98] sm:$0xff]  ;;  %vm934_vm5 = vcmask 1042432   ;;  %vm936_vm6 = vcmask 1043456  }
  0x2e   :  { %v5508_v42 = vpack.c.bf16 %v242_v41, %v241_v40  ;;  %v5512_v45 = vpack.c.bf16 %v330_v44, %v329_v43  ;;  %v331_v46 = vld [vmem:[#allocation2 + $0xa0] sm:$0xff]  ;;  %v332_v47 = vld [vmem:[#allocation2 + $0xa8] sm:$0xff]  ;;  %v333_v50 = vld [vmem:[#allocation2 + $0xb0] sm:$0xff]  ;;  %vm938_vm7 = vcmask 1044480   ;;  %vm5353_vm8 = vmmov 0  }
  0x2f   :  { %430 = vrot.lane.b32.xlu0 %v5448_v14, %s5349_s30  ;;  %v5516_v49 = vpack.c.bf16 %v332_v47, %v331_v46  ;;  %v334_v51 = vld [vmem:[#allocation2 + $0xb8] sm:$0xff]  ;;  %v424_v53 = vld [vmem:[#allocation2 + $0xc0] sm:$0xff]  ;;  %v425_v54 = vld [vmem:[#allocation2 + $0xc8] sm:$0xff]  ;;  %vm946_vm9 = vcmask 64512   ;;  %vm948_vm10 = vcmask 588800   ;;  %vm975_vm11 = vcmask 523264  }
  0x30   :  { %432 = vrot.lane.b32.xlu1 %v5451_v15, %s5349_s30  ;;  %4755 = vmatpush3.bf16.msra.mxu0 %v5440_v11  ;;  %v5523_v52 = vpack.c.bf16 %v334_v51, %v333_v50  ;;  %v5527_v55 = vpack.c.bf16 %v425_v54, %v424_v53  ;;  %v426_v56 = vld [vmem:[#allocation2 + $0xd0] sm:$0xff]  ;;  %v427_v57 = vld [vmem:[#allocation2 + $0xd8] sm:$0xff]  ;;  %v428_v60 = vld [vmem:[#allocation2 + $0xe0] sm:$0xff]  ;;  %vm3612_vm12 = vcmask 74752  }
  0x31   :  { %4757 = vmatprep.subr.bf16.mxu0 %v5455_v16  ;;  %v5531_v58 = vpack.c.bf16 %v427_v57, %v426_v56  ;;  %v429_v61 = vld [vmem:[#allocation2 + $0xe8] sm:$0xff]  ;;  %v516_v63 = vld [vmem:[#allocation2 + $0xf0] sm:$0xff]  ;;  %v521_v9 = vld [vmem:[#allocation2 + $0x118] sm:$0xff] }
  0x32   :  { %v5538_v62 = vpack.c.bf16 %v429_v61, %v428_v60  ;;  %v519_v3 = vld [vmem:[#allocation2 + $0x108] sm:$0xff]  ;;  %v520_v7 = vld [vmem:[#allocation2 + $0x110] sm:$0xff]  ;;  %v608_v12 = vld [vmem:[#allocation2 + $0x120] sm:$0xff] }
  0x33   :  { %522 = vrot.lane.b32.xlu0 %v5448_v14, %s5350_s3  ;;  %v5552_v10 = vpack.c.bf16 %v521_v9, %v520_v7  ;;  %v609_v13 = vld [vmem:[#allocation2 + $0x128] sm:$0xff]  ;;  %v611_v17 = vld [vmem:[#allocation2 + $0x138] sm:$0xff]  ;;  %v612_v20 = vld [vmem:[#allocation2 + $0x140] sm:$0xff] }
  0x34   :  { %524 = vrot.lane.b32.xlu1 %v5451_v15, %s5350_s3  ;;  %4759 = vmatpush3.bf16.msra.mxu0 %v5455_v16  ;;  %v613_v21 = vld [vmem:[#allocation2 + $0x148] sm:$0xff]  ;;  %v702_v26 = vld [vmem:[#allocation2 + $0x150] sm:$0xff]  ;;  %v703_v27 = vld [vmem:[#allocation2 + $0x158] sm:$0xff] }
  0x35   :  { %4761 = vmatprep.subr.bf16.mxu0 %v5464_v22  ;;  %v704_v30 = vld [vmem:[#allocation2 + $0x160] sm:$0xff]  ;;  %v705_v31 = vld [vmem:[#allocation2 + $0x168] sm:$0xff]  ;;  %v706_v34 = vld [vmem:[#allocation2 + $0x170] sm:$0xff] }
  0x36   :  { %v5575_v33 = vpack.c.bf16 %v705_v31, %v704_v30  ;;  %v707_v36 = vld [vmem:[#allocation2 + $0x178] sm:$0xff]  ;;  %v795_v40 = vld [vmem:[#allocation2 + $0x188] sm:$0xff]  ;;  %v796_v43 = vld [vmem:[#allocation2 + $0x190] sm:$0xff] }
  0x37   :  { %708 = vrot.lane.b32.xlu0 %v5471_v23, %s5349_s30  ;;  %v5582_v37 = vpack.c.bf16 %v707_v36, %v706_v34  ;;  %v797_v44 = vld [vmem:[#allocation2 + $0x198] sm:$0xff]  ;;  %v799_v50 = vld [vmem:[#allocation2 + $0x1a8] sm:$0xff]  ;;  %v5605_v54 = vld [vmem:[%s6252_s2] ss:$0 sm:$0xff] }
  0x38   :  { %710 = vrot.lane.b32.xlu1 %v5474_v24, %s5349_s30  ;;  %v5590_v46 = vpack.c.bf16 %v797_v44, %v796_v43  ;;  %v5629_v43 = vld [vmem:[%s6250_s0 + $0x20] sm:$0xff] }
  0x3b   :  { %800 = vrot.lane.b32.xlu0 %v5471_v23, %s5350_s3 }
  0x3c   :  { %802 = vrot.lane.b32.xlu1 %v5474_v24, %s5350_s3 }
  0x99   :  { %v74_v25 = vpop.permute.xlu0 %73 }
  0x9a   :  { %4072 = vmatprep.mubr.msk.f32.mxu0 %vm77_vm2, %v74_v25  ;;  %v244_v39 = vpop.permute.xlu1 %243  ;;  %v5567_v25 = vpack.c.bf16 %v613_v21, %v612_v20 }
  0x9d   :  { %v76_v29 = vpop.permute.xlu0 %75 }
  0x9e   :  { %4073 = vmatmul.mubr.msk.f32.vlgmr.msra.gmra.mrb[0].mxu0 %vm77_vm2, %v76_v29  ;;  %v246_v48 = vpop.permute.xlu1 %245  ;;  %v5571_v29 = vpack.c.bf16 %v703_v27, %v702_v26 }
  0x9f   :  { %4763 = vmatpush3.bf16.msra.mxu0 %v5464_v22  ;;  %4087 = vmatprep.mubr.msk.f32.mxu0 %vm77_vm2, %v55_v0  ;;  %v517_v0 = vld [vmem:[#allocation2 + $0xf8] sm:$0xff] }
  0xa0   :  { %4765 = vmatprep.subr.bf16.mxu0 %v5487_v28  ;;  %v5542_v1 = vpack.c.bf16 %v517_v0, %v516_v63 }
  0xa1   :  { %v431_v59 = vpop.permute.xlu0 %430 }
  0xa2   :  { %v433_v4 = vpop.permute.xlu1 %432 }
  0xa3   :  { %4767 = vmatpush3.bf16.msra.mxu0 %v5487_v28 }
  0xa4   :  { %4769 = vmatprep.subr.bf16.mxu0 %v5493_v32 }
  0xa5   :  { %v523_v6 = vpop.permute.xlu0 %522 }
  0xa6   :  { %v525_v18 = vpop.permute.xlu1 %524 }
  0xa7   :  { %4771 = vmatpush3.bf16.msra.mxu0 %v5493_v32 }
  0xa8   :  { %4773 = vmatprep.subr.bf16.mxu0 %v5497_v35 }
  0xaa   :  { %4088 = vmatmul.mubr.msk.f32.vlgmr.msra.gmra.mrb[0].mxu0 %vm77_vm2, %v5434_v2  ;;  %v518_v2 = vld [vmem:[#allocation2 + $0x100] sm:$0xff] }
  0xab   :  { %4775 = vmatpush3.bf16.msra.mxu0 %v5497_v35  ;;  %4102 = vmatprep.mubr.msk.f32.mxu0 %vm77_vm2, %v244_v39  ;;  %v5546_v5 = vpack.c.bf16 %v519_v3, %v518_v2  ;;  %v794_v39 = vld [vmem:[#allocation2 + $0x180] sm:$0xff] }
  0xac   :  { %4777 = vmatprep.subr.bf16.mxu0 %v5501_v38  ;;  %v5586_v41 = vpack.c.bf16 %v795_v40, %v794_v39  ;;  %v5622_v40 = vld [vmem:[%s6250_s0 + $0x18] sm:$0xff] }
  0xad   :  { %v1993_v44 = vrot.slane %v5622_v40, 1 }
  0xaf   :  { %4779 = vmatpush3.bf16.msra.mxu0 %v5501_v38 }
  0xb0   :  { %4781 = vmatprep.subr.bf16.mxu0 %v5508_v42 }
  0xb3   :  { %4783 = vmatpush3.bf16.msra.mxu0 %v5508_v42 }
  0xb4   :  { %4785 = vmatprep.subr.bf16.mxu0 %v5512_v45 }
  0xb6   :  { %4103 = vmatmul.mubr.msk.f32.vlgmr.msra.gmra.mrb[0].mxu0 %vm77_vm2, %v246_v48  ;;  %v798_v48 = vld [vmem:[#allocation2 + $0x1a0] sm:$0xff] }
  0xb7   :  { %4787 = vmatpush3.bf16.msra.mxu0 %v5512_v45  ;;  %4117 = vmatprep.mubr.msk.f32.mxu0 %vm77_vm2, %v5448_v14  ;;  %v5556_v14 = vpack.c.bf16 %v609_v13, %v608_v12  ;;  %v5596_v51 = vpack.c.bf16 %v799_v50, %v798_v48  ;;  %v2249_v48 = vrot.slane %v5622_v40, 2  ;;  %v2250_v50 = vrot.slane %v5629_v43, 2 }
  0xb8   :  { %4789 = vmatprep.subr.bf16.mxu0 %v5516_v49 }
  0xbb   :  { %4791 = vmatpush3.bf16.msra.mxu0 %v5516_v49 }
  0xbc   :  { %4793 = vmatprep.subr.bf16.mxu0 %v5523_v52 }
  0xbf   :  { %4795 = vmatpush3.bf16.msra.mxu0 %v5523_v52 }
  0xc0   :  { %4797 = vmatprep.subr.bf16.mxu0 %v5527_v55 }
  0xc2   :  { %4118 = vmatmul.mubr.msk.f32.vlgmr.msra.gmra.mrb[0].mxu0 %vm77_vm2, %v5451_v15  ;;  %v610_v15 = vld [vmem:[#allocation2 + $0x130] sm:$0xff] }
  0xc3   :  { %4799 = vmatpush3.bf16.msra.mxu0 %v5527_v55  ;;  %4132 = vmatprep.mubr.msk.f32.mxu0 %vm77_vm2, %v431_v59  ;;  %v5560_v19 = vpack.c.bf16 %v611_v17, %v610_v15 }
  0xc4   :  { %4801 = vmatprep.subr.bf16.mxu0 %v5531_v58 }
  0xc7   :  { %4803 = vmatpush3.bf16.msra.mxu0 %v5531_v58 }
  0xc8   :  { %4805 = vmatprep.subr.bf16.mxu0 %v5538_v62 }
  0xcb   :  { %4807 = vmatpush3.bf16.msra.mxu0 %v5538_v62 }
  0xcc   :  { %4809 = vmatprep.subr.bf16.mxu0 %v5542_v1 }
  0xce   :  { %4133 = vmatmul.mubr.msk.f32.vlgmr.msra.gmra.mrb[0].mxu0 %vm77_vm2, %v433_v4 }
  0xcf   :  { %4811 = vmatpush3.bf16.msra.mxu0 %v5542_v1  ;;  %4147 = vmatprep.mubr.msk.f32.mxu0 %vm77_vm2, %v523_v6 }
  0xd0   :  { %4813 = vmatprep.subr.bf16.mxu0 %v5546_v5 }
  0xd3   :  { %4815 = vmatpush3.bf16.msra.mxu0 %v5546_v5 }
  0xd4   :  { %4817 = vmatprep.subr.bf16.mxu0 %v5552_v10 }
  0xd7   :  { %4819 = vmatpush3.bf16.msra.mxu0 %v5552_v10 }
  0xd8   :  { %4821 = vmatprep.subr.bf16.mxu0 %v5556_v14 }
  0xda   :  { %4148 = vmatmul.mubr.msk.f32.vlgmr.msra.gmra.mrb[0].mxu0 %vm77_vm2, %v525_v18 }
  0xdb   :  { %4823 = vmatpush3.bf16.msra.mxu0 %v5556_v14  ;;  %4162 = vmatprep.mubr.msk.f32.mxu0 %vm77_vm2, %v5471_v23  ;;  %v709_v23 = vpop.permute.xlu0 %708 }
  0xdc   :  { %4825 = vmatprep.subr.bf16.mxu0 %v5560_v19 }
  0xdf   :  { %4827 = vmatpush3.bf16.msra.mxu0 %v5560_v19  ;;  %v801_v47 = vpop.permute.xlu0 %800 }
  0xe0   :  { %4829 = vmatprep.subr.bf16.mxu0 %v5567_v25 }
  0xe3   :  { %4831 = vmatpush3.bf16.msra.mxu0 %v5567_v25 }
  0xe4   :  { %4833 = vmatprep.subr.bf16.mxu0 %v5571_v29 }
  0xe6   :  { %4163 = vmatmul.mubr.msk.f32.vlgmr.msra.gmra.mrb[0].mxu0 %vm77_vm2, %v5474_v24  ;;  %v711_v24 = vpop.permute.xlu1 %710 }
  0xe7   :  { %4835 = vmatpush3.bf16.msra.mxu0 %v5571_v29  ;;  %4177 = vmatprep.mubr.msk.f32.mxu0 %vm77_vm2, %v709_v23 }
  0xe8   :  { %4837 = vmatprep.subr.bf16.mxu0 %v5575_v33 }
  0xea   :  { %v803_v53 = vpop.permute.xlu1 %802 }
  0xeb   :  { %4839 = vmatpush3.bf16.msra.mxu0 %v5575_v33 }
  0xec   :  { %4841 = vmatprep.subr.bf16.mxu0 %v5582_v37 }
  0xef   :  { %4843 = vmatpush3.bf16.msra.mxu0 %v5582_v37 }
  0xf0   :  { %4845 = vmatprep.subr.bf16.mxu0 %v5586_v41 }
  0xf2   :  { %4178 = vmatmul.mubr.msk.f32.vlgmr.msra.gmra.mrb[0].mxu0 %vm77_vm2, %v711_v24  ;;  %v1994_v24 = vrot.slane %v5629_v43, 1 }
  0xf3   :  { %4847 = vmatpush3.bf16.msra.mxu0 %v5586_v41  ;;  %4192 = vmatprep.mubr.msk.f32.mxu0 %vm77_vm2, %v801_v47 }
  0xf4   :  { %4849 = vmatprep.subr.bf16.mxu0 %v5590_v46  ;;  %v5636_v47 = vsel %vm336_vm0, %v1993_v44, %v1994_v24 }
  0xf7   :  { %4851 = vmatpush3.bf16.msra.mxu0 %v5590_v46 }
  0xf8   :  { %4853 = vmatprep.subr.bf16.mxu0 %v5596_v51 }
  0xfb   :  { %4855 = vmatpush3.bf16.msra.mxu0 %v5596_v51 }
  0xfe   :  { %4193 = vmatmul.mubr.msk.f32.vlgmr.msra.gmra.mrb[0].mxu0 %vm77_vm2, %v803_v53  ;;  %v1544_v53 = vld [vmem:[#allocation5 + $0x1c0] sm:$0xff] }
 0x1d1   :  { %v4194_v56 = vpop.f32.mrb[0].mxu0 }
 0x1d2   :  { %v893_v57 = vadd.f32 %v4194_v56, %v5605_v54  ;;  %v874_v59 = vpop.f32.mrb[1].mxu0  ;;  %v1545_v56 = vld [vmem:[#allocation5 + $0x1c8] sm:$0xff] }
 0x1d3   :  { %v892_v60 = vadd.f32 %v5605_v54, %v874_v59  ;;  %v5352_v59 = vmov 0.0|0.0  }
 0x1d4   :  { %v895_v61 = vmax.f32 %v893_v57, 0.0  ;;  %v1546_v57 = vld [vmem:[#allocation5 + $0x1d0] sm:$0xff]  ;;  %4940 = vmatprep.subr.bf16.mxu0 %v5352_v59  ;;  %4856 = vmatprep.subr.bf16.mxu1 %v5352_v59 }
 0x1d5   :  { %v894_v63 = vmax.f32 %v892_v60, 0.0  ;;  %v5645_v60 = vpack.c.bf16 %v1545_v56, %v1544_v53 }
 0x1d6   :  { %900 = vrot.lane.b32.xlu1 %v895_v61, %s5351_s13 }
 0x1d7   :  { %898 = vrot.lane.b32.xlu0 %v894_v63, %s5351_s13  ;;  %4942 = vmatpush3.bf16.msra.mxu0 %v5645_v60 }
 0x1d8   :  { %4943 = vmatprep.subr.bf16.mxu0 %v5352_v59 }
 0x248   :  { %v901_v0 = vpop.permute.xlu1 %900 }
 0x249   :  { %v905_v2 = vmax.f32 %v895_v61, %v901_v0  ;;  %v899_v3 = vpop.permute.xlu0 %898  ;;  %v1547_v61 = vld [vmem:[#allocation5 + $0x1d8] sm:$0xff] }
 0x24a   :  { %v904_v4 = vmax.f32 %v894_v63, %v899_v3  ;;  %v5648_v63 = vsel %vm614_vm1, %v2249_v48, %v2250_v50  ;;  %v5652_v0 = vpack.c.bf16 %v1547_v61, %v1546_v57  ;;  %v1549_v3 = vld [vmem:[#allocation5 + $0x1e8] sm:$0xff]  ;;  %v955_v57 = vld [vmem:[#allocation5] sm:$0xff] }
 0x24b   :  { %v911_v6 = vrot.slane %v905_v2, 1 }
 0x24c   :  { %v907_v7 = vrot.slane %v904_v4, 1  ;;  %4945 = vmatpush3.bf16.msra.mxu0 %v5652_v0 }
 0x24d   :  { %v913_v12 = vmax.f32 %v905_v2, %v911_v6  ;;  %v1548_v2 = vld [vmem:[#allocation5 + $0x1e0] sm:$0xff]  ;;  %4946 = vmatprep.subr.bf16.mxu0 %v5352_v59 }
 0x24e   :  { %v909_v9 = vmax.f32 %v904_v4, %v907_v7  ;;  %v5354_v4 = vmov 0.0   ;;  %v5662_v6 = vpack.c.bf16 %v1549_v3, %v1548_v2  ;;  %v1550_v7 = vld [vmem:[#allocation5 + $0x1f0] sm:$0xff] }
 0x24f   :  { %v922_v20 = vrot.slane %v913_v12, 4  ;;  %v924_v26 = vrot.slane %v913_v12, 5  ;;  %v926_v30 = vrot.slane %v913_v12, 6  ;;  %v928_v23 = vrot.slane %v913_v12, 7  ;;  %4344 = vmatprep.mubr.msk.f32.mxu0 %vm5353_vm8, %v5354_v4  ;;  %4211 = vmatprep.mubr.msk.f32.mxu1 %vm5353_vm8, %v5354_v4 }
 0x250   :  { %v915_v13 = vrot.slane %v909_v9, 1  ;;  %v917_v15 = vrot.slane %v909_v9, 2  ;;  %v919_v17 = vrot.slane %v909_v9, 3  ;;  %4948 = vmatpush3.bf16.msra.mxu0 %v5662_v6 }
 0x251   :  { %4949 = vmatprep.subr.bf16.mxu0 %v5352_v59 }
 0x252   :  { %v931_v18 = vsel %vm930_vm3, %v909_v9, %v915_v13  ;;  %v1551_v9 = vld [vmem:[#allocation5 + $0x1f8] sm:$0xff] }
 0x253   :  { %v933_v21 = vsel %vm932_vm4, %v931_v18, %v917_v15  ;;  %v5668_v12 = vpack.c.bf16 %v1551_v9, %v1550_v7  ;;  %v957_v7 = vld [vmem:[#allocation5 + $0x10] sm:$0xff]  ;;  %v958_v9 = vld [vmem:[#allocation5 + $0x18] sm:$0xff] }
 0x254   :  { %v935_v27 = vsel %vm934_vm5, %v933_v21, %v919_v17 }
 0x255   :  { %v937_v31 = vsel %vm936_vm6, %v935_v27, %v922_v20  ;;  %4951 = vmatpush3.bf16.msra.mxu0 %v5668_v12 }
 0x256   :  { %v939_v34 = vsel %vm938_vm7, %v937_v31, %v924_v26  ;;  %4965 = vmatprep.subr.bf16.mxu0 %v5438_v8  ;;  %v3661_v31 = vld [vmem:[%s6250_s0 + $0x28] sm:$0x3]  ;;  %s5356_s0 = smov 112  }
 0x257   :  { %v940_v36 = vsel %vm614_vm1, %v939_v34, %v926_v30 }
 0x258   :  { %v941_v39 = vsel %vm336_vm0, %v940_v36, %v928_v23  ;;  %v1996_v23 = vrot.slane %v3661_v31, 1  ;;  %v2252_v36 = vrot.slane %v3661_v31, 2 }
 0x259   :  { %943 = vrot.lane.b32.xlu0 %v941_v39, %s5347_s12 }
 0x25a   :  { %v1997_v34 = vsel %vm336_vm0, %v1994_v24, %v1996_v23  ;;  %v5699_v39 = vsel %vm614_vm1, %v2250_v50, %v2252_v36 }
 0x25d   :  { %1745 = vrot.lane.b32.xlu0 %v5622_v40, %s5349_s30 }
 0x261   :  { %1907 = vrot.lane.b32.xlu0 %v5622_v40, %s5350_s3 }
 0x265   :  { %2079 = vrot.lane.b32.xlu0 %v5636_v47, %s5349_s30 }
 0x269   :  { %2164 = vrot.lane.b32.xlu0 %v5636_v47, %s5350_s3 }
 0x26d   :  { %2335 = vrot.lane.b32.xlu0 %v5648_v63, %s5349_s30 }
 0x271   :  { %2420 = vrot.lane.b32.xlu0 %v5648_v63, %s5350_s3 }
 0x2cb   :  { %v944_v13 = vpop.permute.xlu0 %943 }
 0x2cc   :  { %v947_v15 = vsel %vm946_vm9, 0.0, %v944_v13 }
 0x2cd   :  { %v949_v17 = vsel %vm948_vm10, %v947_v15, 0.0 }
 0x2ce   :  { %v951_v18 = vrot.slane %v949_v17, 7  ;;  %v5832_v17 = vpack.c.bf16 %v958_v9, %v957_v7  ;;  %v1293_v7 = vld [vmem:[#allocation5 + $0x110] sm:$0xff]  ;;  %v1294_v9 = vld [vmem:[#allocation5 + $0x118] sm:$0xff] }
 0x2cf   :  { %v1746_v44 = vpop.permute.xlu0 %1745 }
 0x2d0   :  { %v5676_v20 = vsel %vm930_vm3, 0.0, %v951_v18  ;;  %v5679_v21 = vsel %vm930_vm3, %v951_v18, 0.0 }
 0x2d1   :  { %v1468_v26 = vrot.slane %v5679_v21, 2  ;;  %v1467_v27 = vrot.slane %v5676_v20, 2  ;;  %v1215_v50 = vrot.slane %v5679_v21, 1  ;;  %v1214_v53 = vrot.slane %v5676_v20, 1 }
 0x2d3   :  { %v5684_v30 = vsel %vm614_vm1, %v1467_v27, %v1468_v26  ;;  %v5822_v56 = vsel %vm336_vm0, %v1214_v53, %v1215_v50  ;;  %v959_v26 = vld [vmem:[#allocation5 + $0x20] sm:$0xff]  ;;  %v960_v27 = vld [vmem:[#allocation5 + $0x28] sm:$0xff] }
 0x2d4   :  { %1552 = vrot.lane.b32.xlu1 %v5684_v30, %s5355_s17  ;;  %v5839_v36 = vpack.c.bf16 %v960_v27, %v959_v26  ;;  %v1209_v53 = vld [vmem:[#allocation5 + $0xe0] sm:$0xff]  ;;  %v1298_v26 = vld [vmem:[#allocation5 + $0x138] sm:$0xff] }
 0x2d5   :  { %v1375_v27 = vld [vmem:[#allocation5 + $0x140] sm:$0xff] }
 0x2d8   :  { %1747 = vrot.lane.b32.xlu1 %v5629_v43, %s5349_s30 }
 0x2dc   :  { %1909 = vrot.lane.b32.xlu1 %v5629_v43, %s5350_s3 }
 0x2e0   :  { %2081 = vrot.lane.b32.xlu1 %v1997_v34, %s5349_s30 }
 0x2e4   :  { %2166 = vrot.lane.b32.xlu1 %v1997_v34, %s5350_s3 }
 0x2e8   :  { %2337 = vrot.lane.b32.xlu1 %v5699_v39, %s5349_s30  ;;  %s5317_s30 = scalar_lea.vmem %s3621_s29, 32 }
 0x2e9   :  { %p5318_p2 = scmp.ne.s32.totalorder %s3621_s29, %s5317_s30  ;;  %p5323_p4 = scmp.lt.s32.totalorder %s5317_s30, %s5317_s30 }
 0x2eb   :  { %p5324_p5 = por %p5323_p4, %p5322_p3 }
 0x2ec   :  { %2422 = vrot.lane.b32.xlu1 %v5699_v39, %s5350_s3 }
 0x2ed   :  { %p5325_p6 = pnand %p5324_p5, %p5318_p2 }
 0x346   :  { %v1553_v48 = vpop.permute.xlu1 %1552 }
 0x347   :  { %4345 = vmatmul.mubr.msk.f32.vlgmr.msra.gmra.mrb[2].mxu0 %vm975_vm11, %v1553_v48 }
 0x348   :  { %4967 = vmatpush3.bf16.msra.mxu0 %v5438_v8  ;;  %4378 = vmatprep.mubr.msk.f32.mxu0 %vm77_vm2, %v1746_v44  ;;  %v1908_v8 = vpop.permute.xlu0 %1907 }
 0x349   :  { %4969 = vmatprep.subr.bf16.mxu0 %v5440_v11 }
 0x34a   :  { %v1748_v24 = vpop.permute.xlu1 %1747 }
 0x34c   :  { %4971 = vmatpush3.bf16.msra.mxu0 %v5440_v11 }
 0x34d   :  { %4973 = vmatprep.subr.bf16.mxu0 %v5455_v16 }
 0x34e   :  { %v1910_v11 = vpop.permute.xlu1 %1909 }
 0x350   :  { %4975 = vmatpush3.bf16.msra.mxu0 %v5455_v16  ;;  %v2080_v16 = vpop.permute.xlu0 %2079 }
 0x351   :  { %4977 = vmatprep.subr.bf16.mxu0 %v5464_v22 }
 0x353   :  { %4379 = vmatmul.mubr.msk.f32.vlgmr.msra.gmra.mrb[4].mxu0 %vm77_vm2, %v1748_v24  ;;  %v961_v24 = vld [vmem:[#allocation5 + $0x30] sm:$0xff] }
 0x354   :  { %4979 = vmatpush3.bf16.msra.mxu0 %v5464_v22  ;;  %4393 = vmatprep.mubr.msk.f32.mxu0 %vm77_vm2, %v5622_v40  ;;  %v2082_v22 = vpop.permute.xlu1 %2081 }
 0x355   :  { %4981 = vmatprep.subr.bf16.mxu0 %v5487_v28 }
 0x358   :  { %4983 = vmatpush3.bf16.msra.mxu0 %v5487_v28  ;;  %v2165_v28 = vpop.permute.xlu0 %2164 }
 0x359   :  { %4985 = vmatprep.subr.bf16.mxu0 %v5493_v32 }
 0x35c   :  { %4987 = vmatpush3.bf16.msra.mxu0 %v5493_v32  ;;  %v2167_v32 = vpop.permute.xlu1 %2166 }
 0x35d   :  { %4989 = vmatprep.subr.bf16.mxu0 %v5497_v35 }
 0x35f   :  { %4394 = vmatmul.mubr.msk.f32.vlgmr.msra.gmra.mrb[4].mxu0 %vm77_vm2, %v5629_v43 }
 0x360   :  { %4991 = vmatpush3.bf16.msra.mxu0 %v5497_v35  ;;  %4408 = vmatprep.mubr.msk.f32.mxu0 %vm77_vm2, %v1908_v8  ;;  %v2336_v35 = vpop.permute.xlu0 %2335  ;;  %v962_v8 = vld [vmem:[#allocation5 + $0x38] sm:$0xff] }
 0x361   :  { %4993 = vmatprep.subr.bf16.mxu0 %v5501_v38 }
 0x364   :  { %4995 = vmatpush3.bf16.msra.mxu0 %v5501_v38  ;;  %v2338_v38 = vpop.permute.xlu1 %2337 }
 0x365   :  { %4997 = vmatprep.subr.bf16.mxu0 %v5508_v42 }
 0x368   :  { %4999 = vmatpush3.bf16.msra.mxu0 %v5508_v42  ;;  %v2421_v42 = vpop.permute.xlu0 %2420 }
 0x369   :  { %5001 = vmatprep.subr.bf16.mxu0 %v5512_v45 }
 0x36b   :  { %4409 = vmatmul.mubr.msk.f32.vlgmr.msra.gmra.mrb[4].mxu0 %vm77_vm2, %v1910_v11 }
 0x36c   :  { %5003 = vmatpush3.bf16.msra.mxu0 %v5512_v45  ;;  %4423 = vmatprep.mubr.msk.f32.mxu0 %vm77_vm2, %v5636_v47  ;;  %v2423_v45 = vpop.permute.xlu1 %2422 }
 0x36d   :  { %5005 = vmatprep.subr.bf16.mxu0 %v5516_v49 }
 0x370   :  { %5007 = vmatpush3.bf16.msra.mxu0 %v5516_v49  ;;  %v964_v49 = vld [vmem:[#allocation5 + $0x40] sm:$0xff] }
 0x371   :  { %5009 = vmatprep.subr.bf16.mxu0 %v5523_v52 }
 0x374   :  { %5011 = vmatpush3.bf16.msra.mxu0 %v5523_v52  ;;  %v965_v52 = vld [vmem:[#allocation5 + $0x48] sm:$0xff] }
 0x375   :  { %5013 = vmatprep.subr.bf16.mxu0 %v5527_v55 }
 0x377   :  { %4424 = vmatmul.mubr.msk.f32.vlgmr.msra.gmra.mrb[4].mxu0 %vm77_vm2, %v1997_v34 }
 0x378   :  { %5015 = vmatpush3.bf16.msra.mxu0 %v5527_v55  ;;  %4438 = vmatprep.mubr.msk.f32.mxu0 %vm77_vm2, %v2080_v16  ;;  %v966_v55 = vld [vmem:[#allocation5 + $0x50] sm:$0xff] }
 0x379   :  { %5017 = vmatprep.subr.bf16.mxu0 %v5531_v58 }
 0x37c   :  { %5019 = vmatpush3.bf16.msra.mxu0 %v5531_v58  ;;  %v5793_v58 = vpack.c.bf16 %v965_v52, %v964_v49  ;;  %v1123_v52 = vld [vmem:[#allocation5 + $0x90] sm:$0xff] }
 0x37d   :  { %5021 = vmatprep.subr.bf16.mxu0 %v5538_v62 }
 0x37e   :  { %4858 = vmatpush3.bf16.msra.mxu1 %v5793_v58 }
 0x37f   :  { %4859 = vmatprep.subr.bf16.mxu1 %v5352_v59 }
 0x380   :  { %5023 = vmatpush3.bf16.msra.mxu0 %v5538_v62  ;;  %v967_v62 = vld [vmem:[#allocation5 + $0x58] sm:$0xff] }
 0x381   :  { %5025 = vmatprep.subr.bf16.mxu0 %v5542_v1 }
 0x383   :  { %4439 = vmatmul.mubr.msk.f32.vlgmr.msra.gmra.mrb[4].mxu0 %vm77_vm2, %v2082_v22 }
 0x384   :  { %5027 = vmatpush3.bf16.msra.mxu0 %v5542_v1  ;;  %4453 = vmatprep.mubr.msk.f32.mxu0 %vm77_vm2, %v2165_v28 }
 0x385   :  { %5029 = vmatprep.subr.bf16.mxu0 %v5546_v5 }
 0x388   :  { %5031 = vmatpush3.bf16.msra.mxu0 %v5546_v5 }
 0x389   :  { %5033 = vmatprep.subr.bf16.mxu0 %v5552_v10 }
 0x38c   :  { %5035 = vmatpush3.bf16.msra.mxu0 %v5552_v10  ;;  %v5798_v10 = vpack.c.bf16 %v967_v62, %v966_v55  ;;  %v1124_v55 = vld [vmem:[#allocation5 + $0x98] sm:$0xff] }
 0x38d   :  { %5037 = vmatprep.subr.bf16.mxu0 %v5556_v14  ;;  %v5862_v62 = vpack.c.bf16 %v1124_v55, %v1123_v52  ;;  %v1462_v52 = vld [vmem:[#allocation5 + $0x198] sm:$0xff] }
 0x38e   :  { %4861 = vmatpush3.bf16.msra.mxu1 %v5798_v10 }
 0x38f   :  { %4454 = vmatmul.mubr.msk.f32.vlgmr.msra.gmra.mrb[4].mxu0 %vm77_vm2, %v2167_v32  ;;  %4862 = vmatprep.subr.bf16.mxu1 %v5352_v59 }
 0x390   :  { %5039 = vmatpush3.bf16.msra.mxu0 %v5556_v14  ;;  %4468 = vmatprep.mubr.msk.f32.mxu0 %vm77_vm2, %v5648_v63  ;;  %v968_v14 = vld [vmem:[#allocation5 + $0x60] sm:$0xff] }
 0x391   :  { %5041 = vmatprep.subr.bf16.mxu0 %v5560_v19 }
 0x394   :  { %5043 = vmatpush3.bf16.msra.mxu0 %v5560_v19  ;;  %v969_v19 = vld [vmem:[#allocation5 + $0x68] sm:$0xff] }
 0x395   :  { %5045 = vmatprep.subr.bf16.mxu0 %v5567_v25 }
 0x398   :  { %5047 = vmatpush3.bf16.msra.mxu0 %v5567_v25  ;;  %v5802_v25 = vpack.c.bf16 %v969_v19, %v968_v14  ;;  %v1126_v14 = vld [vmem:[#allocation5 + $0xa8] sm:$0xff] }
 0x399   :  { %5049 = vmatprep.subr.bf16.mxu0 %v5571_v29 }
 0x39a   :  { %4864 = vmatpush3.bf16.msra.mxu1 %v5802_v25 }
 0x39b   :  { %4469 = vmatmul.mubr.msk.f32.vlgmr.msra.gmra.mrb[4].mxu0 %vm77_vm2, %v5699_v39  ;;  %4865 = vmatprep.subr.bf16.mxu1 %v5352_v59 }
 0x39c   :  { %5051 = vmatpush3.bf16.msra.mxu0 %v5571_v29  ;;  %4483 = vmatprep.mubr.msk.f32.mxu0 %vm77_vm2, %v2336_v35  ;;  %v970_v29 = vld [vmem:[#allocation5 + $0x70] sm:$0xff]  ;;  %v5848_v35 = vpack.c.bf16 %v962_v8, %v961_v24  ;;  %v1379_v24 = vld [vmem:[#allocation5 + $0x160] sm:$0xff]  ;;  %v1380_v8 = vld [vmem:[#allocation5 + $0x168] sm:$0xff] }
 0x39d   :  { %5053 = vmatprep.subr.bf16.mxu0 %v5575_v33 }
 0x3a0   :  { %5055 = vmatpush3.bf16.msra.mxu0 %v5575_v33  ;;  %v971_v33 = vld [vmem:[#allocation5 + $0x78] sm:$0xff] }
 0x3a1   :  { %5057 = vmatprep.subr.bf16.mxu0 %v5582_v37 }
 0x3a4   :  { %5059 = vmatpush3.bf16.msra.mxu0 %v5582_v37  ;;  %v5807_v37 = vpack.c.bf16 %v971_v33, %v970_v29  ;;  %v1127_v29 = vld [vmem:[#allocation5 + $0xb0] sm:$0xff]  ;;  %v1128_v33 = vld [vmem:[#allocation5 + $0xb8] sm:$0xff] }
 0x3a5   :  { %5061 = vmatprep.subr.bf16.mxu0 %v5586_v41 }
 0x3a6   :  { %4867 = vmatpush3.bf16.msra.mxu1 %v5807_v37 }
 0x3a7   :  { %4484 = vmatmul.mubr.msk.f32.vlgmr.msra.gmra.mrb[4].mxu0 %vm77_vm2, %v2338_v38  ;;  %4868 = vmatprep.subr.bf16.mxu1 %v5352_v59 }
 0x3a8   :  { %5063 = vmatpush3.bf16.msra.mxu0 %v5586_v41  ;;  %4498 = vmatprep.mubr.msk.f32.mxu0 %vm77_vm2, %v2421_v42  ;;  %v1121_v42 = vld [vmem:[#allocation5 + $0x80] sm:$0xff] }
 0x3a9   :  { %5065 = vmatprep.subr.bf16.mxu0 %v5590_v46 }
 0x3ac   :  { %5067 = vmatpush3.bf16.msra.mxu0 %v5590_v46 }
 0x3ad   :  { %5069 = vmatprep.subr.bf16.mxu0 %v5596_v51 }
 0x3b0   :  { %5071 = vmatpush3.bf16.msra.mxu0 %v5596_v51 }
 0x3b1   :  { %5156 = vmatprep.subr.bf16.mxu0 %v5352_v59 }
 0x3b3   :  { %4499 = vmatmul.mubr.msk.f32.vlgmr.msra.gmra.mrb[4].mxu0 %vm77_vm2, %v2423_v45  ;;  %v1122_v45 = vld [vmem:[#allocation5 + $0x88] sm:$0xff] }
 0x3b4   :  { %5158 = vmatpush3.bf16.msra.mxu0 %v5645_v60  ;;  %4650 = vmatprep.mubr.msk.f32.mxu0 %vm5353_vm8, %v5354_v4  ;;  %v956_v60 = vld [vmem:[#allocation5 + $0x8] sm:$0xff]  ;;  %v5854_v49 = vpack.c.bf16 %v1122_v45, %v1121_v42  ;;  %v1461_v45 = vld [vmem:[#allocation5 + $0x190] sm:$0xff] }
 0x3b5   :  { %5159 = vmatprep.subr.bf16.mxu0 %v5352_v59  ;;  %v5828_v3 = vpack.c.bf16 %v956_v60, %v955_v57  ;;  %v1211_v60 = vld [vmem:[#allocation5 + $0xf0] sm:$0xff] }
 0x3b8   :  { %5161 = vmatpush3.bf16.msra.mxu0 %v5652_v0 }
 0x3b9   :  { %5162 = vmatprep.subr.bf16.mxu0 %v5352_v59 }
 0x3bc   :  { %5164 = vmatpush3.bf16.msra.mxu0 %v5662_v6 }
 0x3bd   :  { %5165 = vmatprep.subr.bf16.mxu0 %v5352_v59 }
 0x3c0   :  { %5167 = vmatpush3.bf16.msra.mxu0 %v5668_v12 }
 0x3c1   :  { %5180 = vmatprep.subr.bf16.mxu0 %v5352_v59 }
 0x41a   :  { %v5795_v1 = vpop.f32.mrb[2].mxu0 }
 0x41b   :  { %v4346_v5 = vpop.f32.mrb[3].mxu0 }
 0x41c   :  { %v1125_v5 = vld [vmem:[#allocation5 + $0xa0] sm:$0xff] }
 0x41d   :  { %v5868_v19 = vpack.c.bf16 %v1126_v14, %v1125_v5  ;;  %v5939_v5 = vpack.c.bf16 %v1462_v52, %v1461_v45  ;;  %v1463_v14 = vld [vmem:[#allocation5 + $0x1a0] sm:$0xff] }
 0x486   :  { %v4500_v41 = vpop.f32.mrb[4].mxu0 }
 0x487   :  { %v2506_v46 = vadd.f32 %v4500_v41, %v5605_v54  ;;  %v2494_v51 = vpop.f32.mrb[5].mxu0  ;;  %v1205_v41 = vld [vmem:[#allocation5 + $0xc0] sm:$0xff] }
 0x488   :  { %v2505_v40 = vadd.f32 %v5605_v54, %v2494_v51 }
 0x489   :  { %v2508_v43 = vmax.f32 %v2506_v46, 0.0  ;;  %v1206_v46 = vld [vmem:[#allocation5 + $0xc8] sm:$0xff] }
 0x48a   :  { %v2507_v47 = vmax.f32 %v2505_v40, 0.0  ;;  %v5876_v51 = vpack.c.bf16 %v1206_v46, %v1205_v41  ;;  %v1207_v40 = vld [vmem:[#allocation5 + $0xd0] sm:$0xff]  ;;  %v1466_v46 = vld [vmem:[#allocation5 + $0x1b8] sm:$0xff] }
 0x48b   :  { %2513 = vrot.lane.b32.xlu1 %v2508_v43, %s5351_s13  ;;  %v1465_v41 = vld [vmem:[#allocation5 + $0x1b0] sm:$0xff] }
 0x48c   :  { %2511 = vrot.lane.b32.xlu0 %v2507_v47, %s5351_s13 }
 0x48f   :  { %1129 = vrot.lane.b32.xlu1 %v5676_v20, %s5356_s0 }
 0x490   :  { %973 = vrot.lane.b32.xlu0 %v5676_v20, %s5355_s17 }
 0x494   :  { %1299 = vrot.lane.b32.xlu0 %v5822_v56, %s5355_s17 }
 0x498   :  { %1383 = vrot.lane.b32.xlu0 %v5822_v56, %s5356_s0 }
 0x4fd   :  { %v2514_v54 = vpop.permute.xlu1 %2513 }
 0x4fe   :  { %v2518_v61 = vmax.f32 %v2508_v43, %v2514_v54  ;;  %v2512_v63 = vpop.permute.xlu0 %2511  ;;  %v1208_v43 = vld [vmem:[#allocation5 + $0xd8] sm:$0xff]  ;;  %v1210_v54 = vld [vmem:[#allocation5 + $0xe8] sm:$0xff] }
 0x4ff   :  { %v2517_v0 = vmax.f32 %v2507_v47, %v2512_v63  ;;  %v5881_v50 = vpack.c.bf16 %v1208_v43, %v1207_v40  ;;  %v5887_v57 = vpack.c.bf16 %v1210_v54, %v1209_v53  ;;  %v5949_v40 = vpack.c.bf16 %v1466_v46, %v1465_v41  ;;  %v1628_v43 = vld [vmem:[#allocation5 + $0x200] sm:$0xff]  ;;  %v1630_v54 = vld [vmem:[#allocation5 + $0x210] sm:$0xff] }
 0x500   :  { %v2524_v2 = vrot.slane %v2518_v61, 1 }
 0x501   :  { %v2520_v6 = vrot.slane %v2517_v0, 1  ;;  %v1130_v47 = vpop.permute.xlu1 %1129 }
 0x502   :  { %v974_v12 = vpop.permute.xlu0 %973  ;;  %v2526_v15 = vmax.f32 %v2518_v61, %v2524_v2  ;;  %v1212_v61 = vld [vmem:[#allocation5 + $0xf8] sm:$0xff]  ;;  %v1292_v2 = vld [vmem:[#allocation5 + $0x108] sm:$0xff] }
 0x503   :  { %v2522_v13 = vmax.f32 %v2517_v0, %v2520_v6  ;;  %4212 = vmatmul.mubr.msk.f32.vlgmr.msra.gmra.mrb[0].mxu1 %vm975_vm11, %v974_v12  ;;  %v5891_v63 = vpack.c.bf16 %v1212_v61, %v1211_v60  ;;  %v1291_v0 = vld [vmem:[#allocation5 + $0x100] sm:$0xff]  ;;  %v5901_v12 = vpack.c.bf16 %v1294_v9, %v1293_v7  ;;  %v1631_v60 = vld [vmem:[#allocation5 + $0x218] sm:$0xff]  ;;  %v1634_v9 = vld [vmem:[#allocation5 + $0x230] sm:$0xff] }
 0x504   :  { %4870 = vmatpush3.bf16.msra.mxu1 %v5828_v3  ;;  %4230 = vmatprep.mubr.msk.f32.mxu1 %vm5353_vm8, %v5354_v4  ;;  %v2535_v34 = vrot.slane %v2526_v15, 4  ;;  %v2537_v44 = vrot.slane %v2526_v15, 5  ;;  %v2539_v11 = vrot.slane %v2526_v15, 6  ;;  %v2541_v22 = vrot.slane %v2526_v15, 7  ;;  %v1296_v15 = vld [vmem:[#allocation5 + $0x128] sm:$0xff] }
 0x505   :  { %v2528_v18 = vrot.slane %v2522_v13, 1  ;;  %v2530_v21 = vrot.slane %v2522_v13, 2  ;;  %4871 = vmatprep.subr.bf16.mxu1 %v5352_v59  ;;  %v2532_v31 = vrot.slane %v2522_v13, 3  ;;  %v5895_v6 = vpack.c.bf16 %v1292_v2, %v1291_v0  ;;  %v1632_v0 = vld [vmem:[#allocation5 + $0x220] sm:$0xff]  ;;  %v1633_v2 = vld [vmem:[#allocation5 + $0x228] sm:$0xff] }
 0x506   :  { %v5959_v61 = vpack.c.bf16 %v1631_v60, %v1630_v54  ;;  %v5965_v7 = vpack.c.bf16 %v1633_v2, %v1632_v0 }
 0x507   :  { %v2543_v23 = vsel %vm930_vm3, %v2522_v13, %v2528_v18  ;;  %v1295_v13 = vld [vmem:[#allocation5 + $0x120] sm:$0xff] }
 0x508   :  { %4873 = vmatpush3.bf16.msra.mxu1 %v5832_v17  ;;  %v2544_v39 = vsel %vm932_vm4, %v2543_v23, %v2530_v21  ;;  %v5907_v18 = vpack.c.bf16 %v1296_v15, %v1295_v13  ;;  %v1297_v21 = vld [vmem:[#allocation5 + $0x130] sm:$0xff]  ;;  %v1635_v13 = vld [vmem:[#allocation5 + $0x238] sm:$0xff] }
 0x509   :  { %4874 = vmatprep.subr.bf16.mxu1 %v5352_v59  ;;  %v2545_v48 = vsel %vm934_vm5, %v2544_v39, %v2532_v31  ;;  %v1376_v31 = vld [vmem:[#allocation5 + $0x148] sm:$0xff]  ;;  %v1378_v39 = vld [vmem:[#allocation5 + $0x158] sm:$0xff] }
 0x50a   :  { %v2546_v16 = vsel %vm936_vm6, %v2545_v48, %v2535_v34  ;;  %v5915_v23 = vpack.c.bf16 %v1376_v31, %v1375_v27  ;;  %v1377_v34 = vld [vmem:[#allocation5 + $0x150] sm:$0xff] }
 0x50b   :  { %v2547_v28 = vsel %vm938_vm7, %v2546_v16, %v2537_v44  ;;  %v1300_v44 = vpop.permute.xlu0 %1299  ;;  %v5920_v48 = vpack.c.bf16 %v1378_v39, %v1377_v34  ;;  %v1381_v16 = vld [vmem:[#allocation5 + $0x170] sm:$0xff] }
 0x50c   :  { %4876 = vmatpush3.bf16.msra.mxu1 %v5839_v36  ;;  %v2548_v32 = vsel %vm614_vm1, %v2547_v28, %v2539_v11  ;;  %v5926_v11 = vpack.c.bf16 %v1380_v8, %v1379_v24 }
 0x50d   :  { %v2549_v38 = vsel %vm336_vm0, %v2548_v32, %v2541_v22  ;;  %4877 = vmatprep.subr.bf16.mxu1 %v5352_v59  ;;  %v1382_v22 = vld [vmem:[#allocation5 + $0x178] sm:$0xff]  ;;  %v1459_v32 = vld [vmem:[#allocation5 + $0x180] sm:$0xff] }
 0x50e   :  { %2551 = vrot.lane.b32.xlu1 %v2549_v38, %s5347_s12  ;;  %v5930_v28 = vpack.c.bf16 %v1382_v22, %v1381_v16  ;;  %v1460_v38 = vld [vmem:[#allocation5 + $0x188] sm:$0xff] }
 0x50f   :  { %v5934_v42 = vpack.c.bf16 %v1460_v38, %v1459_v32  ;;  %v1384_v55 = vpop.permute.xlu0 %1383 }
 0x510   :  { %4879 = vmatpush3.bf16.msra.mxu1 %v5848_v35 }
 0x511   :  { %4880 = vmatprep.subr.bf16.mxu1 %v5352_v59 }
 0x512   :  { %1636 = vrot.lane.b32.xlu1 %v5684_v30, %s5356_s0 }
 0x513   :  { %4231 = vmatmul.mubr.msk.f32.vlgmr.msra.gmra.mrb[2].mxu1 %vm975_vm11, %v5676_v20  ;;  %v5872_v20 = vpack.c.bf16 %v1128_v33, %v1127_v29  ;;  %v1464_v29 = vld [vmem:[#allocation5 + $0x1a8] sm:$0xff] }
 0x514   :  { %4882 = vmatpush3.bf16.msra.mxu1 %v5854_v49  ;;  %4249 = vmatprep.mubr.msk.f32.mxu1 %vm5353_vm8, %v5354_v4  ;;  %v5945_v33 = vpack.c.bf16 %v1464_v29, %v1463_v14 }
 0x515   :  { %4883 = vmatprep.subr.bf16.mxu1 %v5352_v59 }
 0x518   :  { %4885 = vmatpush3.bf16.msra.mxu1 %v5862_v62 }
 0x519   :  { %4886 = vmatprep.subr.bf16.mxu1 %v5352_v59 }
 0x51c   :  { %4888 = vmatpush3.bf16.msra.mxu1 %v5868_v19 }
 0x51d   :  { %4889 = vmatprep.subr.bf16.mxu1 %v5352_v59 }
 0x520   :  { %4891 = vmatpush3.bf16.msra.mxu1 %v5872_v20 }
 0x521   :  { %4892 = vmatprep.subr.bf16.mxu1 %v5352_v59 }
 0x523   :  { %4250 = vmatmul.mubr.msk.f32.vlgmr.msra.gmra.mrb[4].mxu1 %vm975_vm11, %v1130_v47  ;;  %v1629_v47 = vld [vmem:[#allocation5 + $0x208] sm:$0xff] }
 0x524   :  { %4894 = vmatpush3.bf16.msra.mxu1 %v5876_v51  ;;  %4268 = vmatprep.mubr.msk.f32.mxu1 %vm5353_vm8, %v5354_v4  ;;  %v5953_v53 = vpack.c.bf16 %v1629_v47, %v1628_v43 }
 0x525   :  { %4895 = vmatprep.subr.bf16.mxu1 %v5352_v59 }
 0x528   :  { %4897 = vmatpush3.bf16.msra.mxu1 %v5881_v50 }
 0x529   :  { %4898 = vmatprep.subr.bf16.mxu1 %v5352_v59 }
 0x52c   :  { %4900 = vmatpush3.bf16.msra.mxu1 %v5887_v57 }
 0x52d   :  { %4901 = vmatprep.subr.bf16.mxu1 %v5352_v59 }
 0x530   :  { %4903 = vmatpush3.bf16.msra.mxu1 %v5891_v63 }
 0x531   :  { %4904 = vmatprep.subr.bf16.mxu1 %v5352_v59 }
 0x533   :  { %4269 = vmatmul.mubr.msk.f32.vlgmr.msra.gmra.mrb[6].mxu1 %vm975_vm11, %v5822_v56  ;;  %v5911_v56 = vpack.c.bf16 %v1298_v26, %v1297_v21 }
 0x534   :  { %4906 = vmatpush3.bf16.msra.mxu1 %v5895_v6  ;;  %4287 = vmatprep.mubr.msk.f32.mxu1 %vm5353_vm8, %v5354_v4 }
 0x535   :  { %4907 = vmatprep.subr.bf16.mxu1 %v5352_v59 }
 0x538   :  { %4909 = vmatpush3.bf16.msra.mxu1 %v5901_v12 }
 0x539   :  { %4910 = vmatprep.subr.bf16.mxu1 %v5352_v59 }
 0x53c   :  { %4912 = vmatpush3.bf16.msra.mxu1 %v5907_v18 }
 0x53d   :  { %4913 = vmatprep.subr.bf16.mxu1 %v5352_v59 }
 0x540   :  { %4915 = vmatpush3.bf16.msra.mxu1 %v5911_v56 }
 0x541   :  { %4916 = vmatprep.subr.bf16.mxu1 %v5352_v59 }
 0x543   :  { %4288 = vmatmul.mubr.msk.f32.vlgmr.msra.gmra.mrb[8].mxu1 %vm975_vm11, %v1300_v44 }
 0x544   :  { %4918 = vmatpush3.bf16.msra.mxu1 %v5915_v23  ;;  %4306 = vmatprep.mubr.msk.f32.mxu1 %vm5353_vm8, %v5354_v4 }
 0x545   :  { %4919 = vmatprep.subr.bf16.mxu1 %v5352_v59 }
 0x548   :  { %4921 = vmatpush3.bf16.msra.mxu1 %v5920_v48 }
 0x549   :  { %4922 = vmatprep.subr.bf16.mxu1 %v5352_v59 }
 0x54c   :  { %4924 = vmatpush3.bf16.msra.mxu1 %v5926_v11 }
 0x54d   :  { %4925 = vmatprep.subr.bf16.mxu1 %v5352_v59 }
 0x550   :  { %4927 = vmatpush3.bf16.msra.mxu1 %v5930_v28 }
 0x551   :  { %4928 = vmatprep.subr.bf16.mxu1 %v5352_v59 }
 0x553   :  { %4307 = vmatmul.mubr.msk.f32.vlgmr.msra.gmra.mrb[10].mxu1 %vm975_vm11, %v1384_v55 }
 0x554   :  { %4930 = vmatpush3.bf16.msra.mxu1 %v5934_v42  ;;  %4325 = vmatprep.mubr.msk.f32.mxu1 %vm5353_vm8, %v5354_v4 }
 0x555   :  { %4931 = vmatprep.subr.bf16.mxu1 %v5352_v59 }
 0x558   :  { %4933 = vmatpush3.bf16.msra.mxu1 %v5939_v5 }
 0x559   :  { %4934 = vmatprep.subr.bf16.mxu1 %v5352_v59 }
 0x55c   :  { %4936 = vmatpush3.bf16.msra.mxu1 %v5945_v33 }
 0x55d   :  { %4937 = vmatprep.subr.bf16.mxu1 %v5352_v59 }
 0x560   :  { %4939 = vmatpush3.bf16.msra.mxu1 %v5949_v40 }
 0x561   :  { %4952 = vmatprep.subr.bf16.mxu1 %v5352_v59 }
 0x563   :  { %4326 = vmatmul.mubr.msk.f32.vlgmr.msra.gmra.mrb[12].mxu1 %vm975_vm11, %v5684_v30  ;;  %v5969_v30 = vpack.c.bf16 %v1635_v13, %v1634_v9 }
 0x564   :  { %4954 = vmatpush3.bf16.msra.mxu1 %v5953_v53  ;;  %4363 = vmatprep.mubr.msk.f32.mxu1 %vm5353_vm8, %v5354_v4 }
 0x565   :  { %4955 = vmatprep.subr.bf16.mxu1 %v5352_v59 }
 0x568   :  { %4957 = vmatpush3.bf16.msra.mxu1 %v5959_v61 }
 0x569   :  { %4958 = vmatprep.subr.bf16.mxu1 %v5352_v59 }
 0x56c   :  { %4960 = vmatpush3.bf16.msra.mxu1 %v5965_v7 }
 0x56d   :  { %4961 = vmatprep.subr.bf16.mxu1 %v5352_v59 }
 0x570   :  { %4963 = vmatpush3.bf16.msra.mxu1 %v5969_v30 }
 0x571   :  { %5072 = vmatprep.subr.bf16.mxu1 %v5352_v59 }
 0x580   :  { %v2552_v15 = vpop.permute.xlu1 %2551 }
 0x581   :  { %v2554_v21 = vsel %vm946_vm9, 0.0, %v2552_v15 }
 0x582   :  { %v2555_v26 = vsel %vm948_vm10, %v2554_v21, 0.0 }
 0x583   :  { %v2557_v27 = vrot.slane %v2555_v26, 7 }
 0x584   :  { %v1637_v31 = vpop.permute.xlu1 %1636 }
 0x585   :  { %v2559_v34 = vsel %vm930_vm3, 0.0, %v2557_v27  ;;  %v2560_v39 = vsel %vm930_vm3, %v2557_v27, 0.0  ;;  %4364 = vmatmul.mubr.msk.f32.vlgmr.msra.gmra.mrb[14].mxu1 %vm975_vm11, %v1637_v31 }
 0x586   :  { %v2785_v44 = vrot.slane %v2560_v39, 1  ;;  %2708 = vrot.lane.b32.xlu1 %v2559_v34, %s5356_s0  ;;  %2562 = vrot.lane.b32.xlu0 %v2559_v34, %s5355_s17  ;;  %v2784_v24 = vrot.slane %v2559_v34, 1  ;;  %v3011_v16 = vrot.slane %v2560_v39, 2  ;;  %v3010_v22 = vrot.slane %v2559_v34, 2 }
 0x587   :  { %5074 = vmatpush3.bf16.msra.mxu1 %v5793_v58  ;;  %4517 = vmatprep.mubr.msk.f32.mxu1 %vm5353_vm8, %v5354_v4 }
 0x588   :  { %v5985_v8 = vsel %vm336_vm0, %v2784_v24, %v2785_v44  ;;  %5075 = vmatprep.subr.bf16.mxu1 %v5352_v59  ;;  %v5995_v58 = vsel %vm614_vm1, %v3010_v22, %v3011_v16 }
 0x58a   :  { %2935 = vrot.lane.b32.xlu1 %v5985_v8, %s5356_s0  ;;  %2860 = vrot.lane.b32.xlu0 %v5985_v8, %s5355_s17 }
 0x58b   :  { %5077 = vmatpush3.bf16.msra.mxu1 %v5798_v10 }
 0x58c   :  { %5078 = vmatprep.subr.bf16.mxu1 %v5352_v59 }
 0x58e   :  { %3161 = vrot.lane.b32.xlu1 %v5995_v58, %s5356_s0  ;;  %3086 = vrot.lane.b32.xlu0 %v5995_v58, %s5355_s17 }
 0x58f   :  { %5080 = vmatpush3.bf16.msra.mxu1 %v5802_v25 }
 0x590   :  { %5081 = vmatprep.subr.bf16.mxu1 %v5352_v59 }
 0x593   :  { %5083 = vmatpush3.bf16.msra.mxu1 %v5807_v37 }
 0x594   :  { %5084 = vmatprep.subr.bf16.mxu1 %v5352_v59 }
 0x5d6   :  { %v1044_v10 = vpop.f32.mrb[0].mxu1 }
 0x5d7   :  { %v4213_v32 = vpop.f32.mrb[1].mxu1 }
 0x5d8   :  { %v3692_v32 = vld [vmem:[%s6255_s5 + $0x58] sm:$0xff] }
 0x5e6   :  { %v1116_v38 = vpop.f32.mrb[2].mxu1 }
 0x5e7   :  { %v1117_v45 = vadd.f32 %v1116_v38, %v1044_v10  ;;  %v4232_v52 = vpop.f32.mrb[3].mxu1  ;;  %v3691_v10 = vld [vmem:[%s6255_s5 + $0x50] sm:$0xff] }
 0x5e8   :  { %v5184_v38 = vpack.c.bf16 %v3692_v32, %v3691_v10  ;;  %v3264_v52 = vld [vmem:[%s6255_s5 + $0x18] sm:$0xff]  ;;  %v3713_v10 = vld [vmem:[%s6255_s5 + $0xe8] sm:$0xff] }
 0x5f6   :  { %v1199_v55 = vpop.f32.mrb[4].mxu1 }
 0x5f7   :  { %v1203_v14 = vadd.f32 %v1199_v55, %v1117_v45  ;;  %v4251_v29 = vpop.f32.mrb[5].mxu1  ;;  %v3263_v45 = vld [vmem:[%s6255_s5 + $0x10] sm:$0xff] }
 0x5f8   :  { %v2563_v41 = vpop.permute.xlu0 %2562  ;;  %v5196_v55 = vpack.c.bf16 %v3264_v52, %v3263_v45  ;;  %v3694_v29 = vld [vmem:[%s6255_s5 + $0x68] sm:$0xff]  ;;  %v3714_v52 = vld [vmem:[%s6255_s5 + $0xf0] sm:$0xff] }
 0x5f9   :  { %4518 = vmatmul.mubr.msk.f32.vlgmr.msra.gmra.mrb[16].mxu1 %vm975_vm11, %v2563_v41 }
 0x5fa   :  { %5086 = vmatpush3.bf16.msra.mxu1 %v5828_v3  ;;  %4536 = vmatprep.mubr.msk.f32.mxu1 %vm5353_vm8, %v5354_v4 }
 0x5fb   :  { %5087 = vmatprep.subr.bf16.mxu1 %v5352_v59 }
 0x5fc   :  { %v2861_v25 = vpop.permute.xlu0 %2860 }
 0x5fe   :  { %5089 = vmatpush3.bf16.msra.mxu1 %v5832_v17 }
 0x5ff   :  { %5090 = vmatprep.subr.bf16.mxu1 %v5352_v59 }
 0x600   :  { %v3087_v37 = vpop.permute.xlu0 %3086 }
 0x601   :  { %4651 = vmatmul.mubr.msk.f32.vlgmr.msra.gmra.mrb[6].mxu0 %vm975_vm11, %v3087_v37  ;;  %v3266_v37 = vld [vmem:[%s6255_s5 + $0x28] sm:$0xff] }
 0x602   :  { %5092 = vmatpush3.bf16.msra.mxu1 %v5839_v36  ;;  %4688 = vmatprep.mubr.msk.f32.mxu0 %vm5353_vm8, %v5354_v4 }
 0x603   :  { %5093 = vmatprep.subr.bf16.mxu1 %v5352_v59 }
 0x606   :  { %v1285_v3 = vpop.f32.mrb[6].mxu1  ;;  %5095 = vmatpush3.bf16.msra.mxu1 %v5848_v35 }
 0x607   :  { %v1289_v46 = vadd.f32 %v1285_v3, %v1203_v14  ;;  %v4270_v43 = vpop.f32.mrb[7].mxu1  ;;  %5096 = vmatprep.subr.bf16.mxu1 %v5352_v59  ;;  %v3693_v14 = vld [vmem:[%s6255_s5 + $0x60] sm:$0xff] }
 0x608   :  { %v5187_v41 = vpack.c.bf16 %v3694_v29, %v3693_v14  ;;  %v3696_v43 = vld [vmem:[%s6255_s5 + $0x78] sm:$0xff] }
 0x609   :  { %4537 = vmatmul.mubr.msk.f32.vlgmr.msra.gmra.mrb[18].mxu1 %vm975_vm11, %v2559_v34 }
 0x60a   :  { %5098 = vmatpush3.bf16.msra.mxu1 %v5854_v49  ;;  %4555 = vmatprep.mubr.msk.f32.mxu1 %vm5353_vm8, %v5354_v4  ;;  %v2709_v49 = vpop.permute.xlu1 %2708 }
 0x60b   :  { %5099 = vmatprep.subr.bf16.mxu1 %v5352_v59 }
 0x60e   :  { %5101 = vmatpush3.bf16.msra.mxu1 %v5862_v62 }
 0x60f   :  { %5102 = vmatprep.subr.bf16.mxu1 %v5352_v59 }
 0x612   :  { %5104 = vmatpush3.bf16.msra.mxu1 %v5868_v19 }
 0x613   :  { %5105 = vmatprep.subr.bf16.mxu1 %v5352_v59 }
 0x616   :  { %v1369_v17 = vpop.f32.mrb[8].mxu1  ;;  %5107 = vmatpush3.bf16.msra.mxu1 %v5872_v20 }
 0x617   :  { %v1373_v36 = vadd.f32 %v1369_v17, %v1289_v46  ;;  %v4289_v35 = vpop.f32.mrb[9].mxu1  ;;  %5108 = vmatprep.subr.bf16.mxu1 %v5352_v59  ;;  %v3695_v46 = vld [vmem:[%s6255_s5 + $0x70] sm:$0xff] }
 0x619   :  { %4556 = vmatmul.mubr.msk.f32.vlgmr.msra.gmra.mrb[20].mxu1 %vm975_vm11, %v2709_v49 }
 0x61a   :  { %5110 = vmatpush3.bf16.msra.mxu1 %v5876_v51  ;;  %4574 = vmatprep.mubr.msk.f32.mxu1 %vm5353_vm8, %v5354_v4 }
 0x61b   :  { %5111 = vmatprep.subr.bf16.mxu1 %v5352_v59 }
 0x61e   :  { %5113 = vmatpush3.bf16.msra.mxu1 %v5881_v50 }
 0x61f   :  { %5114 = vmatprep.subr.bf16.mxu1 %v5352_v59 }
 0x622   :  { %5116 = vmatpush3.bf16.msra.mxu1 %v5887_v57 }
 0x623   :  { %5117 = vmatprep.subr.bf16.mxu1 %v5352_v59 }
 0x626   :  { %v1453_v62 = vpop.f32.mrb[10].mxu1  ;;  %5119 = vmatpush3.bf16.msra.mxu1 %v5891_v63 }
 0x627   :  { %v1457_v19 = vadd.f32 %v1453_v62, %v1373_v36  ;;  %v4308_v20 = vpop.f32.mrb[11].mxu1  ;;  %5120 = vmatprep.subr.bf16.mxu1 %v5352_v59  ;;  %v5190_v36 = vpack.c.bf16 %v3696_v43, %v3695_v46  ;;  %v3267_v62 = vld [vmem:[%s6255_s5 + $0x30] sm:$0xff] }
 0x629   :  { %4575 = vmatmul.mubr.msk.f32.vlgmr.msra.gmra.mrb[22].mxu1 %vm975_vm11, %v5985_v8 }
 0x62a   :  { %5122 = vmatpush3.bf16.msra.mxu1 %v5895_v6  ;;  %4593 = vmatprep.mubr.msk.f32.mxu1 %vm5353_vm8, %v5354_v4 }
 0x62b   :  { %5123 = vmatprep.subr.bf16.mxu1 %v5352_v59 }
 0x62e   :  { %5125 = vmatpush3.bf16.msra.mxu1 %v5901_v12  ;;  %v6079_v12 = vld [vmem:[%s6254_s4] ss:$0 sm:$0xff] }
 0x62f   :  { %5126 = vmatprep.subr.bf16.mxu1 %v5352_v59 }
 0x632   :  { %5128 = vmatpush3.bf16.msra.mxu1 %v5907_v18 }
 0x633   :  { %5129 = vmatprep.subr.bf16.mxu1 %v5352_v59 }
 0x636   :  { %v1538_v51 = vpop.f32.mrb[12].mxu1  ;;  %5131 = vmatpush3.bf16.msra.mxu1 %v5911_v56 }
 0x637   :  { %v1542_v50 = vadd.f32 %v1538_v51, %v1457_v19  ;;  %v4327_v57 = vpop.f32.mrb[13].mxu1  ;;  %5132 = vmatprep.subr.bf16.mxu1 %v5352_v59  ;;  %v3268_v19 = vld [vmem:[%s6255_s5 + $0x38] sm:$0xff] }
 0x638   :  { %v5202_v20 = vpack.c.bf16 %v3268_v19, %v3267_v62 }
 0x639   :  { %4594 = vmatmul.mubr.msk.f32.vlgmr.msra.gmra.mrb[24].mxu1 %vm975_vm11, %v2861_v25  ;;  %v1626_v63 = vadd.f32 %v5795_v1, %v1542_v50  ;;  %v2936_v1 = vpop.permute.xlu1 %2935  ;;  %v3265_v25 = vld [vmem:[%s6255_s5 + $0x20] sm:$0xff] }
 0x63a   :  { %5134 = vmatpush3.bf16.msra.mxu1 %v5915_v23  ;;  %4612 = vmatprep.mubr.msk.f32.mxu1 %vm5353_vm8, %v5354_v4  ;;  %v5199_v3 = vpack.c.bf16 %v3266_v37, %v3265_v25 }
 0x63b   :  { %5135 = vmatprep.subr.bf16.mxu1 %v5352_v59 }
 0x63e   :  { %5137 = vmatpush3.bf16.msra.mxu1 %v5920_v48 }
 0x63f   :  { %5138 = vmatprep.subr.bf16.mxu1 %v5352_v59 }
 0x642   :  { %5140 = vmatpush3.bf16.msra.mxu1 %v5926_v11  ;;  %v3162_v11 = vpop.permute.xlu1 %3161 }
 0x643   :  { %5141 = vmatprep.subr.bf16.mxu1 %v5352_v59 }
 0x646   :  { %5143 = vmatpush3.bf16.msra.mxu1 %v5930_v28  ;;  %v3689_v28 = vld [vmem:[%s6255_s5 + $0x40] sm:$0xff] }
 0x647   :  { %5144 = vmatprep.subr.bf16.mxu1 %v5352_v59 }
 0x649   :  { %4613 = vmatmul.mubr.msk.f32.vlgmr.msra.gmra.mrb[26].mxu1 %vm975_vm11, %v2936_v1 }
 0x64a   :  { %5146 = vmatpush3.bf16.msra.mxu1 %v5934_v42  ;;  %4631 = vmatprep.mubr.msk.f32.mxu1 %vm5353_vm8, %v5354_v4  ;;  %v3690_v42 = vld [vmem:[%s6255_s5 + $0x48] sm:$0xff] }
 0x64b   :  { %5147 = vmatprep.subr.bf16.mxu1 %v5352_v59 }
 0x64e   :  { %5149 = vmatpush3.bf16.msra.mxu1 %v5939_v5  ;;  %v3261_v5 = vld [vmem:[%s6255_s5] sm:$0xff] }
 0x64f   :  { %5150 = vmatprep.subr.bf16.mxu1 %v5352_v59 }
 0x652   :  { %5152 = vmatpush3.bf16.msra.mxu1 %v5945_v33  ;;  %v5181_v33 = vpack.c.bf16 %v3690_v42, %v3689_v28 }
 0x653   :  { %5153 = vmatprep.subr.bf16.mxu1 %v5352_v59 }
 0x654   :  { %5182 = vmatpush3.bf16.msra.mxu0 %v5181_v33 }
 0x655   :  { %5183 = vmatprep.subr.bf16.mxu0 %v5352_v59 }
 0x656   :  { %5155 = vmatpush3.bf16.msra.mxu1 %v5949_v40  ;;  %v3262_v40 = vld [vmem:[%s6255_s5 + $0x8] sm:$0xff] }
 0x657   :  { %5168 = vmatprep.subr.bf16.mxu1 %v5352_v59  ;;  %v5193_v47 = vpack.c.bf16 %v3262_v40, %v3261_v5 }
 0x658   :  { %v1706_v6 = vpop.f32.mrb[14].mxu1  ;;  %5185 = vmatpush3.bf16.msra.mxu0 %v5184_v38  ;;  %v3705_v38 = vld [vmem:[%s6255_s5 + $0xb0] sm:$0xff] }
 0x659   :  { %v1710_v18 = vadd.f32 %v1706_v6, %v1626_v63  ;;  %4632 = vmatmul.mubr.msk.f32.vlgmr.msra.gmra.mrb[28].mxu1 %vm975_vm11, %v5995_v58  ;;  %v4365_v56 = vpop.f32.mrb[15].mxu1  ;;  %5186 = vmatprep.subr.bf16.mxu0 %v5352_v59 }
 0x65a   :  { %5170 = vmatpush3.bf16.msra.mxu1 %v5953_v53  ;;  %4669 = vmatprep.mubr.msk.f32.mxu1 %vm5353_vm8, %v5354_v4 }
 0x65b   :  { %v6087_v23 = vadd.f32 %v6079_v12, %v1710_v18  ;;  %5171 = vmatprep.subr.bf16.mxu1 %v5352_v59 }
 0x65c   :  { %5188 = vmatpush3.bf16.msra.mxu0 %v5187_v41 }
 0x65d   :  { %v1719_v48 = vmax.f32 %v6087_v23, 0.0  ;;  %5189 = vmatprep.subr.bf16.mxu0 %v5352_v59  ;;  %v3699_v23 = vld [vmem:[%s6255_s5 + $0x80] sm:$0xff] }
 0x65e   :  { %5173 = vmatpush3.bf16.msra.mxu1 %v5959_v61 }
 0x65f   :  { %1721 = vrot.lane.b32.xlu0 %v1719_v48, %s5351_s13  ;;  %5174 = vmatprep.subr.bf16.mxu1 %v5352_v59 }
 0x660   :  { %5191 = vmatpush3.bf16.msra.mxu0 %v5190_v36 }
 0x661   :  { %5204 = vmatprep.subr.bf16.mxu0 %v5352_v59 }
 0x662   :  { %5176 = vmatpush3.bf16.msra.mxu1 %v5965_v7 }
 0x663   :  { %5177 = vmatprep.subr.bf16.mxu1 %v5352_v59 }
 0x666   :  { %5179 = vmatpush3.bf16.msra.mxu1 %v5969_v30 }
 0x667   :  { %5192 = vmatprep.subr.bf16.mxu1 %v5352_v59 }
 0x669   :  { %4670 = vmatmul.mubr.msk.f32.vlgmr.msra.gmra.mrb[30].mxu1 %vm975_vm11, %v3162_v11 }
 0x66a   :  { %4707 = vmatprep.mubr.msk.f32.mxu1 %vm5353_vm8, %v5354_v4  ;;  %5194 = vmatpush3.bf16.msra.mxu1 %v5193_v47 }
 0x66b   :  { %5195 = vmatprep.subr.bf16.mxu1 %v5352_v59 }
 0x66e   :  { %5197 = vmatpush3.bf16.msra.mxu1 %v5196_v55  ;;  %v3715_v55 = vld [vmem:[%s6255_s5 + $0xf8] sm:$0xff] }
 0x66f   :  { %5198 = vmatprep.subr.bf16.mxu1 %v5352_v59  ;;  %v5226_v29 = vpack.c.bf16 %v3715_v55, %v3714_v52 }
 0x672   :  { %5200 = vmatpush3.bf16.msra.mxu1 %v5199_v3 }
 0x673   :  { %5201 = vmatprep.subr.bf16.mxu1 %v5352_v59 }
 0x676   :  { %5203 = vmatpush3.bf16.msra.mxu1 %v5202_v20 }
 0x677   :  { %5216 = vmatprep.subr.bf16.mxu1 %v5352_v59 }
 0x6cc   :  { %v2632_v53 = vpop.f32.mrb[16].mxu1 }
 0x6cd   :  { %v4519_v54 = vpop.f32.mrb[17].mxu1 }
 0x6d1   :  { %v1722_v57 = vpop.permute.xlu0 %1721 }
 0x6d2   :  { %v1724_v63 = vmax.f32 %v1719_v48, %v1722_v57  ;;  %v3700_v48 = vld [vmem:[%s6255_s5 + $0x88] sm:$0xff] }
 0x6d4   :  { %v3156_v60 = vpop.f32.mrb[6].mxu0  ;;  %v1726_v1 = vrot.slane %v1724_v63, 1 }
 0x6d5   :  { %v4652_v61 = vpop.f32.mrb[7].mxu0 }
 0x6d6   :  { %v1728_v6 = vmax.f32 %v1724_v63, %v1726_v1 }
 0x6d8   :  { %v1730_v18 = vrot.slane %v1728_v6, 1  ;;  %v1732_v56 = vrot.slane %v1728_v6, 2  ;;  %v1734_v33 = vrot.slane %v1728_v6, 3 }
 0x6da   :  { %v1736_v28 = vsel %vm930_vm3, %v1728_v6, %v1730_v18 }
 0x6db   :  { %v1737_v5 = vsel %vm932_vm4, %v1736_v28, %v1732_v56 }
 0x6dc   :  { %v2704_v0 = vpop.f32.mrb[18].mxu1  ;;  %v1738_v54 = vsel %vm934_vm5, %v1737_v5, %v1734_v33 }
 0x6dd   :  { %v2705_v2 = vadd.f32 %v2704_v0, %v2632_v53  ;;  %v4538_v7 = vpop.f32.mrb[19].mxu1  ;;  %v3708_v0 = vld [vmem:[%s6255_s5 + $0xc0] sm:$0xff]  ;;  %v3428_v25 = vrot.slane %v1738_v54, 2  ;;  %v3516_v46 = vrot.slane %v1738_v54, 3 }
 0x6ec   :  { %v2778_v9 = vpop.f32.mrb[20].mxu1 }
 0x6ed   :  { %v2782_v13 = vadd.f32 %v2778_v9, %v2705_v2  ;;  %v4557_v30 = vpop.f32.mrb[21].mxu1  ;;  %v3709_v2 = vld [vmem:[%s6255_s5 + $0xc8] sm:$0xff]  ;;  %v3270_v9 = vrot.slane %v1738_v54, 1 }
 0x6fc   :  { %v2855_v15 = vpop.f32.mrb[22].mxu1 }
 0x6fd   :  { %v2859_v21 = vadd.f32 %v2855_v15, %v2782_v13  ;;  %v4576_v26 = vpop.f32.mrb[23].mxu1  ;;  %v5205_v13 = vpack.c.bf16 %v3700_v48, %v3699_v23  ;;  %v3701_v15 = vld [vmem:[%s6255_s5 + $0x90] sm:$0xff] }
 0x70c   :  { %v2930_v27 = vpop.f32.mrb[24].mxu1 }
 0x70d   :  { %v2934_v31 = vadd.f32 %v2930_v27, %v2859_v21  ;;  %v4595_v34 = vpop.f32.mrb[25].mxu1  ;;  %v3702_v21 = vld [vmem:[%s6255_s5 + $0x98] sm:$0xff] }
 0x70e   :  { %v3710_v34 = vld [vmem:[%s6255_s5 + $0xd0] sm:$0xff] }
 0x71c   :  { %v3005_v39 = vpop.f32.mrb[26].mxu1 }
 0x71d   :  { %v3009_v44 = vadd.f32 %v3005_v39, %v2934_v31  ;;  %v4614_v24 = vpop.f32.mrb[27].mxu1  ;;  %v5217_v31 = vpack.c.bf16 %v3709_v2, %v3708_v0  ;;  %v3711_v39 = vld [vmem:[%s6255_s5 + $0xd8] sm:$0xff] }
 0x71e   :  { %v5208_v24 = vpack.c.bf16 %v3702_v21, %v3701_v15 }
 0x72c   :  { %v3081_v8 = vpop.f32.mrb[28].mxu1 }
 0x72d   :  { %v3085_v16 = vadd.f32 %v3081_v8, %v3009_v44  ;;  %v4633_v22 = vpop.f32.mrb[29].mxu1  ;;  %v3703_v8 = vld [vmem:[%s6255_s5 + $0xa0] sm:$0xff] }
 0x72e   :  { %v5220_v22 = vpack.c.bf16 %v3711_v39, %v3710_v34 }
 0x72f   :  { %v3160_v58 = vadd.f32 %v3156_v60, %v3085_v16  ;;  %v3704_v16 = vld [vmem:[%s6255_s5 + $0xa8] sm:$0xff] }
 0x730   :  { %v5211_v32 = vpack.c.bf16 %v3704_v16, %v3703_v8 }
 0x73c   :  { %v3231_v17 = vpop.f32.mrb[30].mxu1 }
 0x73d   :  { %v3235_v35 = vadd.f32 %v3231_v17, %v3160_v58  ;;  %v4671_v49 = vpop.f32.mrb[31].mxu1  ;;  %v3712_v58 = vld [vmem:[%s6255_s5 + $0xe0] sm:$0xff] }
 0x73e   :  { %v5223_v45 = vpack.c.bf16 %v3713_v10, %v3712_v58 }
 0x73f   :  { %v3236_v51 = vadd.f32 %v6079_v12, %v3235_v35 }
 0x741   :  { %v3237_v50 = vmax.f32 %v3236_v51, 0.0 }
 0x743   :  { %3239 = vrot.lane.b32.xlu1 %v3237_v50, %s5351_s13 }
 0x7b5   :  { %v3240_v11 = vpop.permute.xlu1 %3239 }
 0x7b6   :  { %v3242_v12 = vmax.f32 %v3237_v50, %v3240_v11  ;;  %v3717_v50 = vld [vmem:[%s6256_s6] ss:$0 sm:$0xff] }
 0x7b8   :  { %v3244_v42 = vrot.slane %v3242_v12, 1 }
 0x7ba   :  { %v3246_v40 = vmax.f32 %v3242_v12, %v3244_v42 }
 0x7bc   :  { %v3248_v47 = vrot.slane %v3246_v40, 1  ;;  %v3250_v53 = vrot.slane %v3246_v40, 2  ;;  %v3252_v60 = vrot.slane %v3246_v40, 3 }
 0x7be   :  { %v3254_v61 = vsel %vm930_vm3, %v3246_v40, %v3248_v47 }
 0x7bf   :  { %v3255_v7 = vsel %vm932_vm4, %v3254_v61, %v3250_v53 }
 0x7c0   :  { %v3256_v30 = vsel %vm934_vm5, %v3255_v7, %v3252_v60 }
 0x7c1   :  { %v3272_v26 = vsel %vm930_vm3, %v3270_v9, %v3256_v30  ;;  %v3258_v27 = vrot.slane %v3256_v30, 7  ;;  %v3430_v41 = vrot.slane %v3256_v30, 1  ;;  %v3518_v37 = vrot.slane %v3256_v30, 2 }
 0x7c2   :  { %4689 = vmatmul.mubr.msk.f32.vlgmr.msra.gmra.mrb[8].mxu0 %vm975_vm11, %v3272_v26 }
 0x7c3   :  { %5206 = vmatpush3.bf16.msra.mxu0 %v5205_v13  ;;  %v3260_v44 = vsel %vm930_vm3, %v1738_v54, %v3258_v27  ;;  %4726 = vmatprep.mubr.msk.f32.mxu0 %vm5353_vm8, %v5354_v4  ;;  %v3432_v3 = vsel %vm930_vm3, %v3428_v25, %v3430_v41  ;;  %v3520_v43 = vsel %vm930_vm3, %v3516_v46, %v3518_v37 }
 0x7c4   :  { %4708 = vmatmul.mubr.msk.f32.vlgmr.msra.gmra.mrb[32].mxu1 %vm975_vm11, %v3260_v44  ;;  %5207 = vmatprep.subr.bf16.mxu0 %v5352_v59 }
 0x7c5   :  { %5218 = vmatpush3.bf16.msra.mxu1 %v5217_v31  ;;  %4745 = vmatprep.mubr.msk.f32.mxu1 %vm5353_vm8, %v5354_v4  ;;  %v3706_v4 = vld [vmem:[%s6255_s5 + $0xb8] sm:$0xff] }
 0x7c6   :  { %5219 = vmatprep.subr.bf16.mxu1 %v5352_v59  ;;  %v5214_v14 = vpack.c.bf16 %v3706_v4, %v3705_v38 }
 0x7c7   :  { %5209 = vmatpush3.bf16.msra.mxu0 %v5208_v24 }
 0x7c8   :  { %5210 = vmatprep.subr.bf16.mxu0 %v5352_v59 }
 0x7c9   :  { %5221 = vmatpush3.bf16.msra.mxu1 %v5220_v22 }
 0x7ca   :  { %5222 = vmatprep.subr.bf16.mxu1 %v5352_v59 }
 0x7cb   :  { %5212 = vmatpush3.bf16.msra.mxu0 %v5211_v32 }
 0x7cc   :  { %5213 = vmatprep.subr.bf16.mxu0 %v5352_v59 }
 0x7cd   :  { %5224 = vmatpush3.bf16.msra.mxu1 %v5223_v45 }
 0x7ce   :  { %5225 = vmatprep.subr.bf16.mxu1 %v5352_v59 }
 0x7cf   :  { %5215 = vmatpush3.bf16.msra.mxu0 %v5214_v14 }
 0x7d1   :  { %5227 = vmatpush3.bf16.msra.mxu1 %v5226_v29 }
 0x7d2   :  { %4727 = vmatmul.mubr.msk.f32.vlgmr.msra.gmra.mrb[10].mxu0 %vm975_vm11, %v3432_v3 }
 0x7d4   :  { %4746 = vmatmul.mubr.msk.f32.vlgmr.msra.gmra.mrb[34].mxu1 %vm975_vm11, %v3520_v43 }
 0x895   :  { %v3351_v17 = vpop.f32.mrb[8].mxu0 }
 0x896   :  { %v4690_v36 = vpop.f32.mrb[9].mxu0 }
 0x897   :  { %v3424_v35 = vpop.f32.mrb[32].mxu1 }
 0x898   :  { %v3425_v49 = vadd.f32 %v3424_v35, %v3351_v17  ;;  %v4709_v62 = vpop.f32.mrb[33].mxu1 }
 0x8a5   :  { %v3511_v19 = vpop.f32.mrb[10].mxu0 }
 0x8a6   :  { %v3515_v59 = vadd.f32 %v3511_v19, %v3425_v49  ;;  %v4728_v20 = vpop.f32.mrb[11].mxu0 }
 0x8a7   :  { %v3599_v51 = vpop.f32.mrb[34].mxu1 }
 0x8a8   :  { %v3603_v57 = vadd.f32 %v3599_v51, %v3515_v59  ;;  %v4747_v63 = vpop.f32.mrb[35].mxu1 }
 0x8aa   :  { %v3611_v1 = vadd.f32 %v3717_v50, %v3603_v57 }
 0x8ac   :  { %3613 = vst.msk [vmem:[#allocation7] sm:$0x3] %vm3612_vm12, %v3611_v1 }
 0x8ad   :  { %5328 = shalt.err (!%p5325_p6)
}
 0x8ae   :  { %s5329_s3 = scalar_lea.hbm %s6257_s7, 32 }
 0x8af   :  { %p5330_p7 = scmp.ne.s32.totalorder %s6257_s7, %s5329_s3  ;;  %p5333_p8 = scmp.lt.u32.totalorder %s5329_s3, %s6257_s7 }
 0x8b1   :  { %p5335_p9 = pnand %p5333_p8, %p5330_p7 }
 0x8b3   :  { %5338 = shalt.err (!%p5335_p9)
}
 0x8b4   :  { %3623 = dma.vmem_to_hbm [thread:$0]  %s3621_s29, 32, %s6257_s7, [#allocation4]  }
 0x8b5   :  { %5343 = dma.done.wait [#allocation4], 32  }
 0x8b6   :  { %5344 = vsyncadd [#allocation4], 4294967264 }
 0x8b7   :  { %3627 = vsyncpa [#allocation3], 1 }
 0x8b8   :  { %3628 = vsyncpa [#allocation6], 1 }
 0x8b9   :  { %3629 = vsyncpa [#allocation4], 1 }

</bundles_post_ra>
